<compile_context>
chip_gen: v7x
topology: tpu7x:2x2x1
jax: 0.10.0
libtpu: 0.0.40
codegen_flags: <defaults>
</compile_context>

<pallas_src>
import jax
import jax.numpy as jnp
from jax import lax
from jax.experimental import pallas as pl
from jax.experimental.pallas import tpu as pltpu

# cfg (small, synthetic — matches the PyTorch module's shapes)
NUM_AGENTS = 4
NUM_HIDDEN = 32
BATCH = 8

NEG_SLOPE = 0.01          # nn.LeakyReLU default
SINKHORN_ITERS = 10
EPS = 1e-8                # F.normalize eps

AA = NUM_AGENTS * NUM_AGENTS   # 16

# Explicit matmul precision (review item): DEFAULT = one bf16 MXU pass per dot
# (fastest; kernel and reference round identically).  Use HIGHEST for fp32
# parity with a PyTorch fp32 forward.
MATMUL_PRECISION = lax.Precision.DEFAULT


def _round_up(n, m):
    return ((n + m - 1) // m) * m


def fused_matching_kernel(x_ref, w_ref, b_ref, o_ref):
    """5-layer MLP + softplus + 10 Sinkhorn L1 normalizations, fully fused.

    x_ref: (bt, 2*AA)  activations for this batch tile  ([p_flat | q_flat])
    w_ref: (5, H, H)   resident weight slab (layer 1 de-interleaved, layer 5 padded)
    b_ref: (5, H)      resident bias slab (layer 5 padded)
    o_ref: (bt, AA)    doubly-normalized flattened matching matrices
    """
    A = NUM_AGENTS
    bt = x_ref.shape[0]

    # ---- MLP: 4x (Linear + LeakyReLU) + final Linear -----------------------
    b_all = b_ref[...]                                   # (5, H), one tiny tile
    h = x_ref[...]                                       # (bt, 2*AA) == (bt, H)
    for layer in range(4):
        h = jnp.dot(h, w_ref[layer], precision=MATMUL_PRECISION,
                    preferred_element_type=jnp.float32)
        h = h + b_all[layer:layer + 1, :]
        h = jnp.where(h > 0.0, h, NEG_SLOPE * h)         # LeakyReLU
    r = jnp.dot(h, w_ref[4], precision=MATMUL_PRECISION,
                preferred_element_type=jnp.float32) + b_all[4:5, :]
    r = r[:, :AA]                                        # valid outputs = first AA cols

    # ---- softplus (numerically stable; matches jax.nn.softplus / F.softplus)
    r = jnp.maximum(r, 0.0) + jnp.log1p(jnp.exp(-jnp.abs(r)))

    # ---- Sinkhorn on a single (bt, AA) lane tensor --------------------------
    # Flattened row-major: lane k == matrix entry (i, j) with i = k // A, j = k % A.
    def rot(v, s):
        # Circular lane rotation over the AA-wide last axis: out[:, k] = v[:, (k - s) % AA].
        # Expressed as static slice + concat (robust Mosaic lowering).
        return jnp.concatenate([v[:, AA - s:], v[:, :AA - s]], axis=1)

    def nr_recip(d):
        # EUP approximate reciprocal + 2 Newton steps (f32-accurate) instead of
        # the exact divide sequence on the serial VPU chain.
        y = pl.reciprocal(d, approx=True)
        y = y * (2.0 - d * y)
        return y * (2.0 - d * y)

    lane = lax.broadcasted_iota(jnp.int32, (bt, AA), 1)
    row_end = (lane % A) == (A - 1)                      # last lane of each matrix row

    for _ in range(SINKHORN_ITERS):
        # dim=1 (normalize matrix columns): lanes {k, k±A, k±2A, ...} share a column.
        # softplus guarantees r > 0, so sum == sum(|.|) as in the reference.
        cs = r
        for m in range(1, A):
            cs = cs + rot(r, m * A)
        r = r * nr_recip(jnp.maximum(cs, EPS))

        # dim=2 (normalize matrix rows): A-wide trailing-window lane sum, valid at
        # each row's last lane; mask it out there and spread it back over the row.
        win = r
        shift = 1
        while shift < A:                                 # A is a power of two
            win = win + rot(win, shift)
            shift *= 2
        t = jnp.where(row_end, win, 0.0)
        rs = t
        for s in range(1, A):
            rs = rs + rot(t, AA - s)
        r = r * nr_recip(jnp.maximum(rs, EPS))

    o_ref[...] = r


def init_params(key, num_agents=NUM_AGENTS, num_hidden=NUM_HIDDEN):
    """PyTorch-style uniform(-1/sqrt(fan_in), 1/sqrt(fan_in)) init.

    Weights stored as (in_features, out_features), i.e. y = x @ W + b.
    """
    sizes = [num_agents * num_agents * 2, num_hidden, num_hidden,
             num_hidden, num_hidden, num_agents * num_agents]
    params = []
    for i in range(len(sizes) - 1):
        fan_in, fan_out = sizes[i], sizes[i + 1]
        key, kw, kb = jax.random.split(key, 3)
        bound = 1.0 / jnp.sqrt(fan_in)
        w = jax.random.uniform(kw, (fan_in, fan_out), jnp.float32, -bound, bound)
        b = jax.random.uniform(kb, (1, fan_out), jnp.float32, -bound, bound)
        params.append((w, b))
    return params


def pack_params(params, num_agents=NUM_AGENTS, num_hidden=NUM_HIDDEN):
    """One-time host-side packing of the 5 (W, b) pairs into two resident slabs."""
    (w1, b1), (w2, b2), (w3, b3), (w4, b4), (w5, b5) = params
    H = num_hidden
    aa = num_agents * num_agents
    # Slab packing assumes a square slab; here 2*AA == H (32 == 32).
    assert 2 * aa == H, "slab packing assumes num_hidden == 2 * num_agents**2"
    assert w1.shape == (2 * aa, H) and w5.shape == (H, aa)
    # x = stack([p, q], -1).view(B, 2*aa): even input rows act on p, odd on q.
    # De-interleave once so the kernel consumes x = [p_flat | q_flat].
    w_first = jnp.concatenate([w1[0::2, :], w1[1::2, :]], axis=0)      # (H, H)
    w_last = jnp.zeros((H, H), jnp.float32).at[:, :aa].set(w5)         # pad (H, aa) -> (H, H)
    b_last = jnp.zeros((H,), jnp.float32).at[:aa].set(b5.reshape(-1))
    wslab = jnp.stack([w_first, w2, w3, w4, w_last])                   # (5, H, H)
    bslab = jnp.stack([b1.reshape(-1), b2.reshape(-1), b3.reshape(-1),
                       b4.reshape(-1), b_last])                        # (5, H)
    return wslab, bslab


def matching_net_forward(p, q, wslab, bslab, *, block_b=128):
    """Batched forward. block_b = batch rows per grid step (128 fits the v5e MXU
    M-pass; 256 fills v6e/v7x).  Weights stay VMEM-resident across the grid.
    For block_b >= 128 the output could additionally be presented lane-dense
    ((B*AA/128, 128)) for unmasked stores; irrelevant at the demo batch size."""
    B = p.shape[0]
    A = NUM_AGENTS
    # Layer-1 merge: feed [p_flat | q_flat]; matches the de-interleaved w_first.
    x = jnp.concatenate([p.reshape(B, AA), q.reshape(B, AA)],
                        axis=1).astype(jnp.float32)                    # (B, 2*AA)

    assert block_b % 8 == 0
    bt = min(block_b, _round_up(B, 8))          # batch tile (sublane-aligned)
    Bp = _round_up(B, bt)
    if Bp != B:
        x = jnp.pad(x, ((0, Bp - B), (0, 0)))   # padded rows are sliced off below

    r = pl.pallas_call(
        fused_matching_kernel,
        out_shape=jax.ShapeDtypeStruct((Bp, AA), jnp.float32),
        grid=(Bp // bt,),
        in_specs=[
            pl.BlockSpec((bt, 2 * AA), lambda i: (i, 0)),                    # tiled activations
            pl.BlockSpec((5, NUM_HIDDEN, NUM_HIDDEN), lambda i: (0, 0, 0)),  # resident weights
            pl.BlockSpec((5, NUM_HIDDEN), lambda i: (0, 0)),                 # resident biases
        ],
        out_specs=pl.BlockSpec((bt, AA), lambda i: (i, 0)),
        compiler_params=pltpu.CompilerParams(
            dimension_semantics=("parallel",)),    # shard batch tiles over 2 TCs on v7x
    )(x, wslab, bslab)
    return r[:B].reshape(B, A, A)


def matching_net_reference(p, q, params):
    """Pure-JAX reference matching the PyTorch forward semantics."""
    B = p.shape[0]
    A = NUM_AGENTS
    x = jnp.stack([p, q], axis=-1).reshape(B, A * A * 2).astype(jnp.float32)
    h = x
    for i, (w, b) in enumerate(params):
        h = jnp.dot(h, w, precision=MATMUL_PRECISION) + b
        if i < len(params) - 1:
            h = jnp.where(h > 0, h, NEG_SLOPE * h)
    r = jax.nn.softplus(h.reshape(B, A, A))
    for _ in range(SINKHORN_ITERS):
        r = r / jnp.maximum(jnp.sum(jnp.abs(r), axis=1, keepdims=True), EPS)
        r = r / jnp.maximum(jnp.sum(jnp.abs(r), axis=2, keepdims=True), EPS)
    return r


if __name__ == "__main__":
    key = jax.random.PRNGKey(0)
    kp, kq, kparams = jax.random.split(key, 3)
    p = jax.random.normal(kp, (BATCH, NUM_AGENTS, NUM_AGENTS), jnp.float32)
    q = jax.random.normal(kq, (BATCH, NUM_AGENTS, NUM_AGENTS), jnp.float32)
    params = init_params(kparams)
    wslab, bslab = pack_params(params)

    fwd = jax.jit(matching_net_forward)
    out = jax.block_until_ready(fwd(p, q, wslab, bslab))

    ref = matching_net_reference(p, q, params)
    assert out.shape == (BATCH, NUM_AGENTS, NUM_AGENTS)
    assert jnp.allclose(out, ref, atol=1e-5, rtol=1e-5), "Pallas output mismatch vs reference"
    print("KERNEL_OK")
</pallas_src>

<mosaic_0001>
module attributes {stable_mosaic.version = 11 : i64} {
  func.func @fused_matching_kernel(%arg0: i32, %arg1: memref<8x32xf32, #tpu.memory_space<vmem>>, %arg2: memref<5x32x32xf32, #tpu.memory_space<vmem>>, %arg3: memref<5x32xf32, #tpu.memory_space<vmem>>, %arg4: memref<8x16xf32, #tpu.memory_space<vmem>>) attributes {dimension_semantics = [#tpu.dimension_semantics<parallel>], iteration_bounds = array<i64: 1>, scalar_prefetch = 0 : i64, scratch_operands = 0 : i64, tpu.core_type = #tpu.core_type<tc>, window_params = [{transform_indices = @transform_0, window_bounds = array<i64: 8, 32>}, {pipeline_mode = #tpu.pipeline_mode<synchronous>, transform_indices = @transform_1, window_bounds = array<i64: 5, 32, 32>}, {pipeline_mode = #tpu.pipeline_mode<synchronous>, transform_indices = @transform_2, window_bounds = array<i64: 5, 32>}, {transform_indices = @transform_3, window_bounds = array<i64: 8, 16>}]} {
    %c0 = arith.constant 0 : index
    %c0_0 = arith.constant 0 : index
    %0 = vector.load %arg3[%c0, %c0_0] : memref<5x32xf32, #tpu.memory_space<vmem>>, vector<5x32xf32>
    %c0_1 = arith.constant 0 : index
    %c0_2 = arith.constant 0 : index
    %1 = vector.load %arg1[%c0_1, %c0_2] : memref<8x32xf32, #tpu.memory_space<vmem>>, vector<8x32xf32>
    %c0_3 = arith.constant 0 : index
    %c0_4 = arith.constant 0 : index
    %c0_5 = arith.constant 0 : index
    %2 = vector.load %arg2[%c0_3, %c0_4, %c0_5] : memref<5x32x32xf32, #tpu.memory_space<vmem>>, vector<1x32x32xf32>
    %3 = vector.shape_cast %2 : vector<1x32x32xf32> to vector<32x32xf32>
    %cst = arith.constant dense<0.000000e+00> : vector<8x32xf32>
    %4 = tpu.matmul %1, %3, %cst {dimension_numbers = #tpu.dot_dimension_numbers<[1], [0], [0], [1], [0, 0, 1, 1], [], []>} : vector<8x32xf32>, vector<32x32xf32>, vector<8x32xf32> -> vector<8x32xf32>
    %5 = vector.extract_strided_slice %0 {offsets = [0, 0], sizes = [1, 32], strides = [1, 1]} : vector<5x32xf32> to vector<1x32xf32>
    %6 = vector.broadcast %5 : vector<1x32xf32> to vector<8x32xf32>
    %7 = arith.addf %4, %6 : vector<8x32xf32>
    %cst_6 = arith.constant 0.000000e+00 : f32
    %8 = vector.broadcast %cst_6 : f32 to vector<8x32xf32>
    %9 = arith.cmpf ogt, %7, %8 : vector<8x32xf32>
    %cst_7 = arith.constant 0.00999999977 : f32
    %10 = vector.broadcast %cst_7 : f32 to vector<8x32xf32>
    %11 = arith.mulf %10, %7 : vector<8x32xf32>
    %12 = arith.select %9, %7, %11 : vector<8x32xi1>, vector<8x32xf32>
    %c1 = arith.constant 1 : index
    %c0_8 = arith.constant 0 : index
    %c0_9 = arith.constant 0 : index
    %13 = vector.load %arg2[%c1, %c0_8, %c0_9] : memref<5x32x32xf32, #tpu.memory_space<vmem>>, vector<1x32x32xf32>
    %14 = vector.shape_cast %13 : vector<1x32x32xf32> to vector<32x32xf32>
    %cst_10 = arith.constant dense<0.000000e+00> : vector<8x32xf32>
    %15 = tpu.matmul %12, %14, %cst_10 {dimension_numbers = #tpu.dot_dimension_numbers<[1], [0], [0], [1], [0, 0, 1, 1], [], []>} : vector<8x32xf32>, vector<32x32xf32>, vector<8x32xf32> -> vector<8x32xf32>
    %16 = vector.extract_strided_slice %0 {offsets = [1, 0], sizes = [1, 32], strides = [1, 1]} : vector<5x32xf32> to vector<1x32xf32>
    %17 = vector.broadcast %16 : vector<1x32xf32> to vector<8x32xf32>
    %18 = arith.addf %15, %17 : vector<8x32xf32>
    %cst_11 = arith.constant 0.000000e+00 : f32
    %19 = vector.broadcast %cst_11 : f32 to vector<8x32xf32>
    %20 = arith.cmpf ogt, %18, %19 : vector<8x32xf32>
    %cst_12 = arith.constant 0.00999999977 : f32
    %21 = vector.broadcast %cst_12 : f32 to vector<8x32xf32>
    %22 = arith.mulf %21, %18 : vector<8x32xf32>
    %23 = arith.select %20, %18, %22 : vector<8x32xi1>, vector<8x32xf32>
    %c2 = arith.constant 2 : index
    %c0_13 = arith.constant 0 : index
    %c0_14 = arith.constant 0 : index
    %24 = vector.load %arg2[%c2, %c0_13, %c0_14] : memref<5x32x32xf32, #tpu.memory_space<vmem>>, vector<1x32x32xf32>
    %25 = vector.shape_cast %24 : vector<1x32x32xf32> to vector<32x32xf32>
    %cst_15 = arith.constant dense<0.000000e+00> : vector<8x32xf32>
    %26 = tpu.matmul %23, %25, %cst_15 {dimension_numbers = #tpu.dot_dimension_numbers<[1], [0], [0], [1], [0, 0, 1, 1], [], []>} : vector<8x32xf32>, vector<32x32xf32>, vector<8x32xf32> -> vector<8x32xf32>
    %27 = vector.extract_strided_slice %0 {offsets = [2, 0], sizes = [1, 32], strides = [1, 1]} : vector<5x32xf32> to vector<1x32xf32>
    %28 = vector.broadcast %27 : vector<1x32xf32> to vector<8x32xf32>
    %29 = arith.addf %26, %28 : vector<8x32xf32>
    %cst_16 = arith.constant 0.000000e+00 : f32
    %30 = vector.broadcast %cst_16 : f32 to vector<8x32xf32>
    %31 = arith.cmpf ogt, %29, %30 : vector<8x32xf32>
    %cst_17 = arith.constant 0.00999999977 : f32
    %32 = vector.broadcast %cst_17 : f32 to vector<8x32xf32>
    %33 = arith.mulf %32, %29 : vector<8x32xf32>
    %34 = arith.select %31, %29, %33 : vector<8x32xi1>, vector<8x32xf32>
    %c3 = arith.constant 3 : index
    %c0_18 = arith.constant 0 : index
    %c0_19 = arith.constant 0 : index
    %35 = vector.load %arg2[%c3, %c0_18, %c0_19] : memref<5x32x32xf32, #tpu.memory_space<vmem>>, vector<1x32x32xf32>
    %36 = vector.shape_cast %35 : vector<1x32x32xf32> to vector<32x32xf32>
    %cst_20 = arith.constant dense<0.000000e+00> : vector<8x32xf32>
    %37 = tpu.matmul %34, %36, %cst_20 {dimension_numbers = #tpu.dot_dimension_numbers<[1], [0], [0], [1], [0, 0, 1, 1], [], []>} : vector<8x32xf32>, vector<32x32xf32>, vector<8x32xf32> -> vector<8x32xf32>
    %38 = vector.extract_strided_slice %0 {offsets = [3, 0], sizes = [1, 32], strides = [1, 1]} : vector<5x32xf32> to vector<1x32xf32>
    %39 = vector.broadcast %38 : vector<1x32xf32> to vector<8x32xf32>
    %40 = arith.addf %37, %39 : vector<8x32xf32>
    %cst_21 = arith.constant 0.000000e+00 : f32
    %41 = vector.broadcast %cst_21 : f32 to vector<8x32xf32>
    %42 = arith.cmpf ogt, %40, %41 : vector<8x32xf32>
    %cst_22 = arith.constant 0.00999999977 : f32
    %43 = vector.broadcast %cst_22 : f32 to vector<8x32xf32>
    %44 = arith.mulf %43, %40 : vector<8x32xf32>
    %45 = arith.select %42, %40, %44 : vector<8x32xi1>, vector<8x32xf32>
    %c4 = arith.constant 4 : index
    %c0_23 = arith.constant 0 : index
    %c0_24 = arith.constant 0 : index
    %46 = vector.load %arg2[%c4, %c0_23, %c0_24] : memref<5x32x32xf32, #tpu.memory_space<vmem>>, vector<1x32x32xf32>
    %47 = vector.shape_cast %46 : vector<1x32x32xf32> to vector<32x32xf32>
    %cst_25 = arith.constant dense<0.000000e+00> : vector<8x32xf32>
    %48 = tpu.matmul %45, %47, %cst_25 {dimension_numbers = #tpu.dot_dimension_numbers<[1], [0], [0], [1], [0, 0, 1, 1], [], []>} : vector<8x32xf32>, vector<32x32xf32>, vector<8x32xf32> -> vector<8x32xf32>
    %49 = vector.extract_strided_slice %0 {offsets = [4, 0], sizes = [1, 32], strides = [1, 1]} : vector<5x32xf32> to vector<1x32xf32>
    %50 = vector.broadcast %49 : vector<1x32xf32> to vector<8x32xf32>
    %51 = arith.addf %48, %50 : vector<8x32xf32>
    %52 = vector.extract_strided_slice %51 {offsets = [0, 0], sizes = [8, 16], strides = [1, 1]} : vector<8x32xf32> to vector<8x16xf32>
    %cst_26 = arith.constant 0.000000e+00 : f32
    %53 = vector.broadcast %cst_26 : f32 to vector<8x16xf32>
    %54 = arith.maximumf %52, %53 : vector<8x16xf32>
    %55 = math.absf %52 : vector<8x16xf32>
    %cst_27 = arith.constant 0.000000e+00 : f32
    %56 = vector.broadcast %cst_27 : f32 to vector<8x16xf32>
    %57 = arith.subf %56, %55 : vector<8x16xf32>
    %58 = math.exp %57 : vector<8x16xf32>
    %59 = math.log1p %58 : vector<8x16xf32>
    %60 = arith.addf %54, %59 : vector<8x16xf32>
    %61 = tpu.iota {dimensions = array<i32: 1>} : vector<8x16xi32>
    %c4_i32 = arith.constant 4 : i32
    %c0_i32 = arith.constant 0 : i32
    %62 = arith.cmpi eq, %c4_i32, %c0_i32 : i32
    %c1_i32 = arith.constant 1 : i32
    %63 = arith.select %62, %c1_i32, %c4_i32 : i32
    %64 = vector.broadcast %63 : i32 to vector<8x16xi32>
    %65 = arith.remsi %61, %64 : vector<8x16xi32>
    %c0_i32_28 = arith.constant 0 : i32
    %66 = vector.broadcast %c0_i32_28 : i32 to vector<8x16xi32>
    %67 = arith.cmpi ne, %65, %66 : vector<8x16xi32>
    %c0_i32_29 = arith.constant 0 : i32
    %68 = vector.broadcast %c0_i32_29 : i32 to vector<8x16xi32>
    %69 = arith.cmpi slt, %65, %68 : vector<8x16xi32>
    %c0_i32_30 = arith.constant 0 : i32
    %70 = arith.cmpi slt, %63, %c0_i32_30 : i32
    %71 = vector.broadcast %70 : i1 to vector<8x16xi1>
    %72 = vector.broadcast %71 : vector<8x16xi1> to vector<8x16xi1>
    %73 = arith.xori %69, %72 : vector<8x16xi1>
    %74 = arith.andi %73, %67 : vector<8x16xi1>
    %75 = vector.broadcast %63 : i32 to vector<8x16xi32>
    %76 = arith.addi %65, %75 : vector<8x16xi32>
    %77 = arith.select %74, %76, %65 : vector<8x16xi1>, vector<8x16xi32>
    %c3_i32 = arith.constant 3 : i32
    %78 = vector.broadcast %c3_i32 : i32 to vector<8x16xi32>
    %79 = arith.cmpi eq, %77, %78 : vector<8x16xi32>
    %80 = vector.extract_strided_slice %60 {offsets = [0, 12], sizes = [8, 4], strides = [1, 1]} : vector<8x16xf32> to vector<8x4xf32>
    %81 = vector.extract_strided_slice %60 {offsets = [0, 0], sizes = [8, 12], strides = [1, 1]} : vector<8x16xf32> to vector<8x12xf32>
    %82 = tpu.concatenate %80, %81 in 1 : vector<8x4xf32>, vector<8x12xf32> -> vector<8x16xf32>
    %83 = arith.addf %60, %82 : vector<8x16xf32>
    %84 = vector.extract_strided_slice %60 {offsets = [0, 8], sizes = [8, 8], strides = [1, 1]} : vector<8x16xf32> to vector<8x8xf32>
    %85 = vector.extract_strided_slice %60 {offsets = [0, 0], sizes = [8, 8], strides = [1, 1]} : vector<8x16xf32> to vector<8x8xf32>
    %86 = tpu.concatenate %84, %85 in 1 : vector<8x8xf32>, vector<8x8xf32> -> vector<8x16xf32>
    %87 = arith.addf %83, %86 : vector<8x16xf32>
    %88 = vector.extract_strided_slice %60 {offsets = [0, 4], sizes = [8, 12], strides = [1, 1]} : vector<8x16xf32> to vector<8x12xf32>
    %89 = vector.extract_strided_slice %60 {offsets = [0, 0], sizes = [8, 4], strides = [1, 1]} : vector<8x16xf32> to vector<8x4xf32>
    %90 = tpu.concatenate %88, %89 in 1 : vector<8x12xf32>, vector<8x4xf32> -> vector<8x16xf32>
    %91 = arith.addf %87, %90 : vector<8x16xf32>
    %cst_31 = arith.constant 9.99999993E-9 : f32
    %92 = vector.broadcast %cst_31 : f32 to vector<8x16xf32>
    %93 = arith.maximumf %91, %92 : vector<8x16xf32>
    %94 = tpu.reciprocal %93 {approx = true} : vector<8x16xf32> -> vector<8x16xf32>
    %95 = arith.mulf %93, %94 : vector<8x16xf32>
    %cst_32 = arith.constant 2.000000e+00 : f32
    %96 = vector.broadcast %cst_32 : f32 to vector<8x16xf32>
    %97 = arith.subf %96, %95 : vector<8x16xf32>
    %98 = arith.mulf %94, %97 : vector<8x16xf32>
    %99 = arith.mulf %93, %98 : vector<8x16xf32>
    %cst_33 = arith.constant 2.000000e+00 : f32
    %100 = vector.broadcast %cst_33 : f32 to vector<8x16xf32>
    %101 = arith.subf %100, %99 : vector<8x16xf32>
    %102 = arith.mulf %98, %101 : vector<8x16xf32>
    %103 = arith.mulf %60, %102 : vector<8x16xf32>
    %104 = vector.extract_strided_slice %103 {offsets = [0, 15], sizes = [8, 1], strides = [1, 1]} : vector<8x16xf32> to vector<8x1xf32>
    %105 = vector.extract_strided_slice %103 {offsets = [0, 0], sizes = [8, 15], strides = [1, 1]} : vector<8x16xf32> to vector<8x15xf32>
    %106 = tpu.concatenate %104, %105 in 1 : vector<8x1xf32>, vector<8x15xf32> -> vector<8x16xf32>
    %107 = arith.addf %103, %106 : vector<8x16xf32>
    %108 = vector.extract_strided_slice %107 {offsets = [0, 14], sizes = [8, 2], strides = [1, 1]} : vector<8x16xf32> to vector<8x2xf32>
    %109 = vector.extract_strided_slice %107 {offsets = [0, 0], sizes = [8, 14], strides = [1, 1]} : vector<8x16xf32> to vector<8x14xf32>
    %110 = tpu.concatenate %108, %109 in 1 : vector<8x2xf32>, vector<8x14xf32> -> vector<8x16xf32>
    %111 = arith.addf %107, %110 : vector<8x16xf32>
    %cst_34 = arith.constant 0.000000e+00 : f32
    %112 = vector.broadcast %cst_34 : f32 to vector<8x16xf32>
    %113 = arith.select %79, %111, %112 : vector<8x16xi1>, vector<8x16xf32>
    %114 = vector.extract_strided_slice %113 {offsets = [0, 1], sizes = [8, 15], strides = [1, 1]} : vector<8x16xf32> to vector<8x15xf32>
    %115 = vector.extract_strided_slice %113 {offsets = [0, 0], sizes = [8, 1], strides = [1, 1]} : vector<8x16xf32> to vector<8x1xf32>
    %116 = tpu.concatenate %114, %115 in 1 : vector<8x15xf32>, vector<8x1xf32> -> vector<8x16xf32>
    %117 = arith.addf %113, %116 : vector<8x16xf32>
    %118 = vector.extract_strided_slice %113 {offsets = [0, 2], sizes = [8, 14], strides = [1, 1]} : vector<8x16xf32> to vector<8x14xf32>
    %119 = vector.extract_strided_slice %113 {offsets = [0, 0], sizes = [8, 2], strides = [1, 1]} : vector<8x16xf32> to vector<8x2xf32>
    %120 = tpu.concatenate %118, %119 in 1 : vector<8x14xf32>, vector<8x2xf32> -> vector<8x16xf32>
    %121 = arith.addf %117, %120 : vector<8x16xf32>
    %122 = vector.extract_strided_slice %113 {offsets = [0, 3], sizes = [8, 13], strides = [1, 1]} : vector<8x16xf32> to vector<8x13xf32>
    %123 = vector.extract_strided_slice %113 {offsets = [0, 0], sizes = [8, 3], strides = [1, 1]} : vector<8x16xf32> to vector<8x3xf32>
    %124 = tpu.concatenate %122, %123 in 1 : vector<8x13xf32>, vector<8x3xf32> -> vector<8x16xf32>
    %125 = arith.addf %121, %124 : vector<8x16xf32>
    %cst_35 = arith.constant 9.99999993E-9 : f32
    %126 = vector.broadcast %cst_35 : f32 to vector<8x16xf32>
    %127 = arith.maximumf %125, %126 : vector<8x16xf32>
    %128 = tpu.reciprocal %127 {approx = true} : vector<8x16xf32> -> vector<8x16xf32>
    %129 = arith.mulf %127, %128 : vector<8x16xf32>
    %cst_36 = arith.constant 2.000000e+00 : f32
    %130 = vector.broadcast %cst_36 : f32 to vector<8x16xf32>
    %131 = arith.subf %130, %129 : vector<8x16xf32>
    %132 = arith.mulf %128, %131 : vector<8x16xf32>
    %133 = arith.mulf %127, %132 : vector<8x16xf32>
    %cst_37 = arith.constant 2.000000e+00 : f32
    %134 = vector.broadcast %cst_37 : f32 to vector<8x16xf32>
    %135 = arith.subf %134, %133 : vector<8x16xf32>
    %136 = arith.mulf %132, %135 : vector<8x16xf32>
    %137 = arith.mulf %103, %136 : vector<8x16xf32>
    %138 = vector.extract_strided_slice %137 {offsets = [0, 12], sizes = [8, 4], strides = [1, 1]} : vector<8x16xf32> to vector<8x4xf32>
    %139 = vector.extract_strided_slice %137 {offsets = [0, 0], sizes = [8, 12], strides = [1, 1]} : vector<8x16xf32> to vector<8x12xf32>
    %140 = tpu.concatenate %138, %139 in 1 : vector<8x4xf32>, vector<8x12xf32> -> vector<8x16xf32>
    %141 = arith.addf %137, %140 : vector<8x16xf32>
    %142 = vector.extract_strided_slice %137 {offsets = [0, 8], sizes = [8, 8], strides = [1, 1]} : vector<8x16xf32> to vector<8x8xf32>
    %143 = vector.extract_strided_slice %137 {offsets = [0, 0], sizes = [8, 8], strides = [1, 1]} : vector<8x16xf32> to vector<8x8xf32>
    %144 = tpu.concatenate %142, %143 in 1 : vector<8x8xf32>, vector<8x8xf32> -> vector<8x16xf32>
    %145 = arith.addf %141, %144 : vector<8x16xf32>
    %146 = vector.extract_strided_slice %137 {offsets = [0, 4], sizes = [8, 12], strides = [1, 1]} : vector<8x16xf32> to vector<8x12xf32>
    %147 = vector.extract_strided_slice %137 {offsets = [0, 0], sizes = [8, 4], strides = [1, 1]} : vector<8x16xf32> to vector<8x4xf32>
    %148 = tpu.concatenate %146, %147 in 1 : vector<8x12xf32>, vector<8x4xf32> -> vector<8x16xf32>
    %149 = arith.addf %145, %148 : vector<8x16xf32>
    %cst_38 = arith.constant 9.99999993E-9 : f32
    %150 = vector.broadcast %cst_38 : f32 to vector<8x16xf32>
    %151 = arith.maximumf %149, %150 : vector<8x16xf32>
    %152 = tpu.reciprocal %151 {approx = true} : vector<8x16xf32> -> vector<8x16xf32>
    %153 = arith.mulf %151, %152 : vector<8x16xf32>
    %cst_39 = arith.constant 2.000000e+00 : f32
    %154 = vector.broadcast %cst_39 : f32 to vector<8x16xf32>
    %155 = arith.subf %154, %153 : vector<8x16xf32>
    %156 = arith.mulf %152, %155 : vector<8x16xf32>
    %157 = arith.mulf %151, %156 : vector<8x16xf32>
    %cst_40 = arith.constant 2.000000e+00 : f32
    %158 = vector.broadcast %cst_40 : f32 to vector<8x16xf32>
    %159 = arith.subf %158, %157 : vector<8x16xf32>
    %160 = arith.mulf %156, %159 : vector<8x16xf32>
    %161 = arith.mulf %137, %160 : vector<8x16xf32>
    %162 = vector.extract_strided_slice %161 {offsets = [0, 15], sizes = [8, 1], strides = [1, 1]} : vector<8x16xf32> to vector<8x1xf32>
    %163 = vector.extract_strided_slice %161 {offsets = [0, 0], sizes = [8, 15], strides = [1, 1]} : vector<8x16xf32> to vector<8x15xf32>
    %164 = tpu.concatenate %162, %163 in 1 : vector<8x1xf32>, vector<8x15xf32> -> vector<8x16xf32>
    %165 = arith.addf %161, %164 : vector<8x16xf32>
    %166 = vector.extract_strided_slice %165 {offsets = [0, 14], sizes = [8, 2], strides = [1, 1]} : vector<8x16xf32> to vector<8x2xf32>
    %167 = vector.extract_strided_slice %165 {offsets = [0, 0], sizes = [8, 14], strides = [1, 1]} : vector<8x16xf32> to vector<8x14xf32>
    %168 = tpu.concatenate %166, %167 in 1 : vector<8x2xf32>, vector<8x14xf32> -> vector<8x16xf32>
    %169 = arith.addf %165, %168 : vector<8x16xf32>
    %cst_41 = arith.constant 0.000000e+00 : f32
    %170 = vector.broadcast %cst_41 : f32 to vector<8x16xf32>
    %171 = arith.select %79, %169, %170 : vector<8x16xi1>, vector<8x16xf32>
    %172 = vector.extract_strided_slice %171 {offsets = [0, 1], sizes = [8, 15], strides = [1, 1]} : vector<8x16xf32> to vector<8x15xf32>
    %173 = vector.extract_strided_slice %171 {offsets = [0, 0], sizes = [8, 1], strides = [1, 1]} : vector<8x16xf32> to vector<8x1xf32>
    %174 = tpu.concatenate %172, %173 in 1 : vector<8x15xf32>, vector<8x1xf32> -> vector<8x16xf32>
    %175 = arith.addf %171, %174 : vector<8x16xf32>
    %176 = vector.extract_strided_slice %171 {offsets = [0, 2], sizes = [8, 14], strides = [1, 1]} : vector<8x16xf32> to vector<8x14xf32>
    %177 = vector.extract_strided_slice %171 {offsets = [0, 0], sizes = [8, 2], strides = [1, 1]} : vector<8x16xf32> to vector<8x2xf32>
    %178 = tpu.concatenate %176, %177 in 1 : vector<8x14xf32>, vector<8x2xf32> -> vector<8x16xf32>
    %179 = arith.addf %175, %178 : vector<8x16xf32>
    %180 = vector.extract_strided_slice %171 {offsets = [0, 3], sizes = [8, 13], strides = [1, 1]} : vector<8x16xf32> to vector<8x13xf32>
    %181 = vector.extract_strided_slice %171 {offsets = [0, 0], sizes = [8, 3], strides = [1, 1]} : vector<8x16xf32> to vector<8x3xf32>
    %182 = tpu.concatenate %180, %181 in 1 : vector<8x13xf32>, vector<8x3xf32> -> vector<8x16xf32>
    %183 = arith.addf %179, %182 : vector<8x16xf32>
    %cst_42 = arith.constant 9.99999993E-9 : f32
    %184 = vector.broadcast %cst_42 : f32 to vector<8x16xf32>
    %185 = arith.maximumf %183, %184 : vector<8x16xf32>
    %186 = tpu.reciprocal %185 {approx = true} : vector<8x16xf32> -> vector<8x16xf32>
    %187 = arith.mulf %185, %186 : vector<8x16xf32>
    %cst_43 = arith.constant 2.000000e+00 : f32
    %188 = vector.broadcast %cst_43 : f32 to vector<8x16xf32>
    %189 = arith.subf %188, %187 : vector<8x16xf32>
    %190 = arith.mulf %186, %189 : vector<8x16xf32>
    %191 = arith.mulf %185, %190 : vector<8x16xf32>
    %cst_44 = arith.constant 2.000000e+00 : f32
    %192 = vector.broadcast %cst_44 : f32 to vector<8x16xf32>
    %193 = arith.subf %192, %191 : vector<8x16xf32>
    %194 = arith.mulf %190, %193 : vector<8x16xf32>
    %195 = arith.mulf %161, %194 : vector<8x16xf32>
    %196 = vector.extract_strided_slice %195 {offsets = [0, 12], sizes = [8, 4], strides = [1, 1]} : vector<8x16xf32> to vector<8x4xf32>
    %197 = vector.extract_strided_slice %195 {offsets = [0, 0], sizes = [8, 12], strides = [1, 1]} : vector<8x16xf32> to vector<8x12xf32>
    %198 = tpu.concatenate %196, %197 in 1 : vector<8x4xf32>, vector<8x12xf32> -> vector<8x16xf32>
    %199 = arith.addf %195, %198 : vector<8x16xf32>
    %200 = vector.extract_strided_slice %195 {offsets = [0, 8], sizes = [8, 8], strides = [1, 1]} : vector<8x16xf32> to vector<8x8xf32>
    %201 = vector.extract_strided_slice %195 {offsets = [0, 0], sizes = [8, 8], strides = [1, 1]} : vector<8x16xf32> to vector<8x8xf32>
    %202 = tpu.concatenate %200, %201 in 1 : vector<8x8xf32>, vector<8x8xf32> -> vector<8x16xf32>
    %203 = arith.addf %199, %202 : vector<8x16xf32>
    %204 = vector.extract_strided_slice %195 {offsets = [0, 4], sizes = [8, 12], strides = [1, 1]} : vector<8x16xf32> to vector<8x12xf32>
    %205 = vector.extract_strided_slice %195 {offsets = [0, 0], sizes = [8, 4], strides = [1, 1]} : vector<8x16xf32> to vector<8x4xf32>
    %206 = tpu.concatenate %204, %205 in 1 : vector<8x12xf32>, vector<8x4xf32> -> vector<8x16xf32>
    %207 = arith.addf %203, %206 : vector<8x16xf32>
    %cst_45 = arith.constant 9.99999993E-9 : f32
    %208 = vector.broadcast %cst_45 : f32 to vector<8x16xf32>
    %209 = arith.maximumf %207, %208 : vector<8x16xf32>
    %210 = tpu.reciprocal %209 {approx = true} : vector<8x16xf32> -> vector<8x16xf32>
    %211 = arith.mulf %209, %210 : vector<8x16xf32>
    %cst_46 = arith.constant 2.000000e+00 : f32
    %212 = vector.broadcast %cst_46 : f32 to vector<8x16xf32>
    %213 = arith.subf %212, %211 : vector<8x16xf32>
    %214 = arith.mulf %210, %213 : vector<8x16xf32>
    %215 = arith.mulf %209, %214 : vector<8x16xf32>
    %cst_47 = arith.constant 2.000000e+00 : f32
    %216 = vector.broadcast %cst_47 : f32 to vector<8x16xf32>
    %217 = arith.subf %216, %215 : vector<8x16xf32>
    %218 = arith.mulf %214, %217 : vector<8x16xf32>
    %219 = arith.mulf %195, %218 : vector<8x16xf32>
    %220 = vector.extract_strided_slice %219 {offsets = [0, 15], sizes = [8, 1], strides = [1, 1]} : vector<8x16xf32> to vector<8x1xf32>
    %221 = vector.extract_strided_slice %219 {offsets = [0, 0], sizes = [8, 15], strides = [1, 1]} : vector<8x16xf32> to vector<8x15xf32>
    %222 = tpu.concatenate %220, %221 in 1 : vector<8x1xf32>, vector<8x15xf32> -> vector<8x16xf32>
    %223 = arith.addf %219, %222 : vector<8x16xf32>
    %224 = vector.extract_strided_slice %223 {offsets = [0, 14], sizes = [8, 2], strides = [1, 1]} : vector<8x16xf32> to vector<8x2xf32>
    %225 = vector.extract_strided_slice %223 {offsets = [0, 0], sizes = [8, 14], strides = [1, 1]} : vector<8x16xf32> to vector<8x14xf32>
    %226 = tpu.concatenate %224, %225 in 1 : vector<8x2xf32>, vector<8x14xf32> -> vector<8x16xf32>
    %227 = arith.addf %223, %226 : vector<8x16xf32>
    %cst_48 = arith.constant 0.000000e+00 : f32
    %228 = vector.broadcast %cst_48 : f32 to vector<8x16xf32>
    %229 = arith.select %79, %227, %228 : vector<8x16xi1>, vector<8x16xf32>
    %230 = vector.extract_strided_slice %229 {offsets = [0, 1], sizes = [8, 15], strides = [1, 1]} : vector<8x16xf32> to vector<8x15xf32>
    %231 = vector.extract_strided_slice %229 {offsets = [0, 0], sizes = [8, 1], strides = [1, 1]} : vector<8x16xf32> to vector<8x1xf32>
    %232 = tpu.concatenate %230, %231 in 1 : vector<8x15xf32>, vector<8x1xf32> -> vector<8x16xf32>
    %233 = arith.addf %229, %232 : vector<8x16xf32>
    %234 = vector.extract_strided_slice %229 {offsets = [0, 2], sizes = [8, 14], strides = [1, 1]} : vector<8x16xf32> to vector<8x14xf32>
    %235 = vector.extract_strided_slice %229 {offsets = [0, 0], sizes = [8, 2], strides = [1, 1]} : vector<8x16xf32> to vector<8x2xf32>
    %236 = tpu.concatenate %234, %235 in 1 : vector<8x14xf32>, vector<8x2xf32> -> vector<8x16xf32>
    %237 = arith.addf %233, %236 : vector<8x16xf32>
    %238 = vector.extract_strided_slice %229 {offsets = [0, 3], sizes = [8, 13], strides = [1, 1]} : vector<8x16xf32> to vector<8x13xf32>
    %239 = vector.extract_strided_slice %229 {offsets = [0, 0], sizes = [8, 3], strides = [1, 1]} : vector<8x16xf32> to vector<8x3xf32>
    %240 = tpu.concatenate %238, %239 in 1 : vector<8x13xf32>, vector<8x3xf32> -> vector<8x16xf32>
    %241 = arith.addf %237, %240 : vector<8x16xf32>
    %cst_49 = arith.constant 9.99999993E-9 : f32
    %242 = vector.broadcast %cst_49 : f32 to vector<8x16xf32>
    %243 = arith.maximumf %241, %242 : vector<8x16xf32>
    %244 = tpu.reciprocal %243 {approx = true} : vector<8x16xf32> -> vector<8x16xf32>
    %245 = arith.mulf %243, %244 : vector<8x16xf32>
    %cst_50 = arith.constant 2.000000e+00 : f32
    %246 = vector.broadcast %cst_50 : f32 to vector<8x16xf32>
    %247 = arith.subf %246, %245 : vector<8x16xf32>
    %248 = arith.mulf %244, %247 : vector<8x16xf32>
    %249 = arith.mulf %243, %248 : vector<8x16xf32>
    %cst_51 = arith.constant 2.000000e+00 : f32
    %250 = vector.broadcast %cst_51 : f32 to vector<8x16xf32>
    %251 = arith.subf %250, %249 : vector<8x16xf32>
    %252 = arith.mulf %248, %251 : vector<8x16xf32>
    %253 = arith.mulf %219, %252 : vector<8x16xf32>
    %254 = vector.extract_strided_slice %253 {offsets = [0, 12], sizes = [8, 4], strides = [1, 1]} : vector<8x16xf32> to vector<8x4xf32>
    %255 = vector.extract_strided_slice %253 {offsets = [0, 0], sizes = [8, 12], strides = [1, 1]} : vector<8x16xf32> to vector<8x12xf32>
    %256 = tpu.concatenate %254, %255 in 1 : vector<8x4xf32>, vector<8x12xf32> -> vector<8x16xf32>
    %257 = arith.addf %253, %256 : vector<8x16xf32>
    %258 = vector.extract_strided_slice %253 {offsets = [0, 8], sizes = [8, 8], strides = [1, 1]} : vector<8x16xf32> to vector<8x8xf32>
    %259 = vector.extract_strided_slice %253 {offsets = [0, 0], sizes = [8, 8], strides = [1, 1]} : vector<8x16xf32> to vector<8x8xf32>
    %260 = tpu.concatenate %258, %259 in 1 : vector<8x8xf32>, vector<8x8xf32> -> vector<8x16xf32>
    %261 = arith.addf %257, %260 : vector<8x16xf32>
    %262 = vector.extract_strided_slice %253 {offsets = [0, 4], sizes = [8, 12], strides = [1, 1]} : vector<8x16xf32> to vector<8x12xf32>
    %263 = vector.extract_strided_slice %253 {offsets = [0, 0], sizes = [8, 4], strides = [1, 1]} : vector<8x16xf32> to vector<8x4xf32>
    %264 = tpu.concatenate %262, %263 in 1 : vector<8x12xf32>, vector<8x4xf32> -> vector<8x16xf32>
    %265 = arith.addf %261, %264 : vector<8x16xf32>
    %cst_52 = arith.constant 9.99999993E-9 : f32
    %266 = vector.broadcast %cst_52 : f32 to vector<8x16xf32>
    %267 = arith.maximumf %265, %266 : vector<8x16xf32>
    %268 = tpu.reciprocal %267 {approx = true} : vector<8x16xf32> -> vector<8x16xf32>
    %269 = arith.mulf %267, %268 : vector<8x16xf32>
    %cst_53 = arith.constant 2.000000e+00 : f32
    %270 = vector.broadcast %cst_53 : f32 to vector<8x16xf32>
    %271 = arith.subf %270, %269 : vector<8x16xf32>
    %272 = arith.mulf %268, %271 : vector<8x16xf32>
    %273 = arith.mulf %267, %272 : vector<8x16xf32>
    %cst_54 = arith.constant 2.000000e+00 : f32
    %274 = vector.broadcast %cst_54 : f32 to vector<8x16xf32>
    %275 = arith.subf %274, %273 : vector<8x16xf32>
    %276 = arith.mulf %272, %275 : vector<8x16xf32>
    %277 = arith.mulf %253, %276 : vector<8x16xf32>
    %278 = vector.extract_strided_slice %277 {offsets = [0, 15], sizes = [8, 1], strides = [1, 1]} : vector<8x16xf32> to vector<8x1xf32>
    %279 = vector.extract_strided_slice %277 {offsets = [0, 0], sizes = [8, 15], strides = [1, 1]} : vector<8x16xf32> to vector<8x15xf32>
    %280 = tpu.concatenate %278, %279 in 1 : vector<8x1xf32>, vector<8x15xf32> -> vector<8x16xf32>
    %281 = arith.addf %277, %280 : vector<8x16xf32>
    %282 = vector.extract_strided_slice %281 {offsets = [0, 14], sizes = [8, 2], strides = [1, 1]} : vector<8x16xf32> to vector<8x2xf32>
    %283 = vector.extract_strided_slice %281 {offsets = [0, 0], sizes = [8, 14], strides = [1, 1]} : vector<8x16xf32> to vector<8x14xf32>
    %284 = tpu.concatenate %282, %283 in 1 : vector<8x2xf32>, vector<8x14xf32> -> vector<8x16xf32>
    %285 = arith.addf %281, %284 : vector<8x16xf32>
    %cst_55 = arith.constant 0.000000e+00 : f32
    %286 = vector.broadcast %cst_55 : f32 to vector<8x16xf32>
    %287 = arith.select %79, %285, %286 : vector<8x16xi1>, vector<8x16xf32>
    %288 = vector.extract_strided_slice %287 {offsets = [0, 1], sizes = [8, 15], strides = [1, 1]} : vector<8x16xf32> to vector<8x15xf32>
    %289 = vector.extract_strided_slice %287 {offsets = [0, 0], sizes = [8, 1], strides = [1, 1]} : vector<8x16xf32> to vector<8x1xf32>
    %290 = tpu.concatenate %288, %289 in 1 : vector<8x15xf32>, vector<8x1xf32> -> vector<8x16xf32>
    %291 = arith.addf %287, %290 : vector<8x16xf32>
    %292 = vector.extract_strided_slice %287 {offsets = [0, 2], sizes = [8, 14], strides = [1, 1]} : vector<8x16xf32> to vector<8x14xf32>
    %293 = vector.extract_strided_slice %287 {offsets = [0, 0], sizes = [8, 2], strides = [1, 1]} : vector<8x16xf32> to vector<8x2xf32>
    %294 = tpu.concatenate %292, %293 in 1 : vector<8x14xf32>, vector<8x2xf32> -> vector<8x16xf32>
    %295 = arith.addf %291, %294 : vector<8x16xf32>
    %296 = vector.extract_strided_slice %287 {offsets = [0, 3], sizes = [8, 13], strides = [1, 1]} : vector<8x16xf32> to vector<8x13xf32>
    %297 = vector.extract_strided_slice %287 {offsets = [0, 0], sizes = [8, 3], strides = [1, 1]} : vector<8x16xf32> to vector<8x3xf32>
    %298 = tpu.concatenate %296, %297 in 1 : vector<8x13xf32>, vector<8x3xf32> -> vector<8x16xf32>
    %299 = arith.addf %295, %298 : vector<8x16xf32>
    %cst_56 = arith.constant 9.99999993E-9 : f32
    %300 = vector.broadcast %cst_56 : f32 to vector<8x16xf32>
    %301 = arith.maximumf %299, %300 : vector<8x16xf32>
    %302 = tpu.reciprocal %301 {approx = true} : vector<8x16xf32> -> vector<8x16xf32>
    %303 = arith.mulf %301, %302 : vector<8x16xf32>
    %cst_57 = arith.constant 2.000000e+00 : f32
    %304 = vector.broadcast %cst_57 : f32 to vector<8x16xf32>
    %305 = arith.subf %304, %303 : vector<8x16xf32>
    %306 = arith.mulf %302, %305 : vector<8x16xf32>
    %307 = arith.mulf %301, %306 : vector<8x16xf32>
    %cst_58 = arith.constant 2.000000e+00 : f32
    %308 = vector.broadcast %cst_58 : f32 to vector<8x16xf32>
    %309 = arith.subf %308, %307 : vector<8x16xf32>
    %310 = arith.mulf %306, %309 : vector<8x16xf32>
    %311 = arith.mulf %277, %310 : vector<8x16xf32>
    %312 = vector.extract_strided_slice %311 {offsets = [0, 12], sizes = [8, 4], strides = [1, 1]} : vector<8x16xf32> to vector<8x4xf32>
    %313 = vector.extract_strided_slice %311 {offsets = [0, 0], sizes = [8, 12], strides = [1, 1]} : vector<8x16xf32> to vector<8x12xf32>
    %314 = tpu.concatenate %312, %313 in 1 : vector<8x4xf32>, vector<8x12xf32> -> vector<8x16xf32>
    %315 = arith.addf %311, %314 : vector<8x16xf32>
    %316 = vector.extract_strided_slice %311 {offsets = [0, 8], sizes = [8, 8], strides = [1, 1]} : vector<8x16xf32> to vector<8x8xf32>
    %317 = vector.extract_strided_slice %311 {offsets = [0, 0], sizes = [8, 8], strides = [1, 1]} : vector<8x16xf32> to vector<8x8xf32>
    %318 = tpu.concatenate %316, %317 in 1 : vector<8x8xf32>, vector<8x8xf32> -> vector<8x16xf32>
    %319 = arith.addf %315, %318 : vector<8x16xf32>
    %320 = vector.extract_strided_slice %311 {offsets = [0, 4], sizes = [8, 12], strides = [1, 1]} : vector<8x16xf32> to vector<8x12xf32>
    %321 = vector.extract_strided_slice %311 {offsets = [0, 0], sizes = [8, 4], strides = [1, 1]} : vector<8x16xf32> to vector<8x4xf32>
    %322 = tpu.concatenate %320, %321 in 1 : vector<8x12xf32>, vector<8x4xf32> -> vector<8x16xf32>
    %323 = arith.addf %319, %322 : vector<8x16xf32>
    %cst_59 = arith.constant 9.99999993E-9 : f32
    %324 = vector.broadcast %cst_59 : f32 to vector<8x16xf32>
    %325 = arith.maximumf %323, %324 : vector<8x16xf32>
    %326 = tpu.reciprocal %325 {approx = true} : vector<8x16xf32> -> vector<8x16xf32>
    %327 = arith.mulf %325, %326 : vector<8x16xf32>
    %cst_60 = arith.constant 2.000000e+00 : f32
    %328 = vector.broadcast %cst_60 : f32 to vector<8x16xf32>
    %329 = arith.subf %328, %327 : vector<8x16xf32>
    %330 = arith.mulf %326, %329 : vector<8x16xf32>
    %331 = arith.mulf %325, %330 : vector<8x16xf32>
    %cst_61 = arith.constant 2.000000e+00 : f32
    %332 = vector.broadcast %cst_61 : f32 to vector<8x16xf32>
    %333 = arith.subf %332, %331 : vector<8x16xf32>
    %334 = arith.mulf %330, %333 : vector<8x16xf32>
    %335 = arith.mulf %311, %334 : vector<8x16xf32>
    %336 = vector.extract_strided_slice %335 {offsets = [0, 15], sizes = [8, 1], strides = [1, 1]} : vector<8x16xf32> to vector<8x1xf32>
    %337 = vector.extract_strided_slice %335 {offsets = [0, 0], sizes = [8, 15], strides = [1, 1]} : vector<8x16xf32> to vector<8x15xf32>
    %338 = tpu.concatenate %336, %337 in 1 : vector<8x1xf32>, vector<8x15xf32> -> vector<8x16xf32>
    %339 = arith.addf %335, %338 : vector<8x16xf32>
    %340 = vector.extract_strided_slice %339 {offsets = [0, 14], sizes = [8, 2], strides = [1, 1]} : vector<8x16xf32> to vector<8x2xf32>
    %341 = vector.extract_strided_slice %339 {offsets = [0, 0], sizes = [8, 14], strides = [1, 1]} : vector<8x16xf32> to vector<8x14xf32>
    %342 = tpu.concatenate %340, %341 in 1 : vector<8x2xf32>, vector<8x14xf32> -> vector<8x16xf32>
    %343 = arith.addf %339, %342 : vector<8x16xf32>
    %cst_62 = arith.constant 0.000000e+00 : f32
    %344 = vector.broadcast %cst_62 : f32 to vector<8x16xf32>
    %345 = arith.select %79, %343, %344 : vector<8x16xi1>, vector<8x16xf32>
    %346 = vector.extract_strided_slice %345 {offsets = [0, 1], sizes = [8, 15], strides = [1, 1]} : vector<8x16xf32> to vector<8x15xf32>
    %347 = vector.extract_strided_slice %345 {offsets = [0, 0], sizes = [8, 1], strides = [1, 1]} : vector<8x16xf32> to vector<8x1xf32>
    %348 = tpu.concatenate %346, %347 in 1 : vector<8x15xf32>, vector<8x1xf32> -> vector<8x16xf32>
    %349 = arith.addf %345, %348 : vector<8x16xf32>
    %350 = vector.extract_strided_slice %345 {offsets = [0, 2], sizes = [8, 14], strides = [1, 1]} : vector<8x16xf32> to vector<8x14xf32>
    %351 = vector.extract_strided_slice %345 {offsets = [0, 0], sizes = [8, 2], strides = [1, 1]} : vector<8x16xf32> to vector<8x2xf32>
    %352 = tpu.concatenate %350, %351 in 1 : vector<8x14xf32>, vector<8x2xf32> -> vector<8x16xf32>
    %353 = arith.addf %349, %352 : vector<8x16xf32>
    %354 = vector.extract_strided_slice %345 {offsets = [0, 3], sizes = [8, 13], strides = [1, 1]} : vector<8x16xf32> to vector<8x13xf32>
    %355 = vector.extract_strided_slice %345 {offsets = [0, 0], sizes = [8, 3], strides = [1, 1]} : vector<8x16xf32> to vector<8x3xf32>
    %356 = tpu.concatenate %354, %355 in 1 : vector<8x13xf32>, vector<8x3xf32> -> vector<8x16xf32>
    %357 = arith.addf %353, %356 : vector<8x16xf32>
    %cst_63 = arith.constant 9.99999993E-9 : f32
    %358 = vector.broadcast %cst_63 : f32 to vector<8x16xf32>
    %359 = arith.maximumf %357, %358 : vector<8x16xf32>
    %360 = tpu.reciprocal %359 {approx = true} : vector<8x16xf32> -> vector<8x16xf32>
    %361 = arith.mulf %359, %360 : vector<8x16xf32>
    %cst_64 = arith.constant 2.000000e+00 : f32
    %362 = vector.broadcast %cst_64 : f32 to vector<8x16xf32>
    %363 = arith.subf %362, %361 : vector<8x16xf32>
    %364 = arith.mulf %360, %363 : vector<8x16xf32>
    %365 = arith.mulf %359, %364 : vector<8x16xf32>
    %cst_65 = arith.constant 2.000000e+00 : f32
    %366 = vector.broadcast %cst_65 : f32 to vector<8x16xf32>
    %367 = arith.subf %366, %365 : vector<8x16xf32>
    %368 = arith.mulf %364, %367 : vector<8x16xf32>
    %369 = arith.mulf %335, %368 : vector<8x16xf32>
    %370 = vector.extract_strided_slice %369 {offsets = [0, 12], sizes = [8, 4], strides = [1, 1]} : vector<8x16xf32> to vector<8x4xf32>
    %371 = vector.extract_strided_slice %369 {offsets = [0, 0], sizes = [8, 12], strides = [1, 1]} : vector<8x16xf32> to vector<8x12xf32>
    %372 = tpu.concatenate %370, %371 in 1 : vector<8x4xf32>, vector<8x12xf32> -> vector<8x16xf32>
    %373 = arith.addf %369, %372 : vector<8x16xf32>
    %374 = vector.extract_strided_slice %369 {offsets = [0, 8], sizes = [8, 8], strides = [1, 1]} : vector<8x16xf32> to vector<8x8xf32>
    %375 = vector.extract_strided_slice %369 {offsets = [0, 0], sizes = [8, 8], strides = [1, 1]} : vector<8x16xf32> to vector<8x8xf32>
    %376 = tpu.concatenate %374, %375 in 1 : vector<8x8xf32>, vector<8x8xf32> -> vector<8x16xf32>
    %377 = arith.addf %373, %376 : vector<8x16xf32>
    %378 = vector.extract_strided_slice %369 {offsets = [0, 4], sizes = [8, 12], strides = [1, 1]} : vector<8x16xf32> to vector<8x12xf32>
    %379 = vector.extract_strided_slice %369 {offsets = [0, 0], sizes = [8, 4], strides = [1, 1]} : vector<8x16xf32> to vector<8x4xf32>
    %380 = tpu.concatenate %378, %379 in 1 : vector<8x12xf32>, vector<8x4xf32> -> vector<8x16xf32>
    %381 = arith.addf %377, %380 : vector<8x16xf32>
    %cst_66 = arith.constant 9.99999993E-9 : f32
    %382 = vector.broadcast %cst_66 : f32 to vector<8x16xf32>
    %383 = arith.maximumf %381, %382 : vector<8x16xf32>
    %384 = tpu.reciprocal %383 {approx = true} : vector<8x16xf32> -> vector<8x16xf32>
    %385 = arith.mulf %383, %384 : vector<8x16xf32>
    %cst_67 = arith.constant 2.000000e+00 : f32
    %386 = vector.broadcast %cst_67 : f32 to vector<8x16xf32>
    %387 = arith.subf %386, %385 : vector<8x16xf32>
    %388 = arith.mulf %384, %387 : vector<8x16xf32>
    %389 = arith.mulf %383, %388 : vector<8x16xf32>
    %cst_68 = arith.constant 2.000000e+00 : f32
    %390 = vector.broadcast %cst_68 : f32 to vector<8x16xf32>
    %391 = arith.subf %390, %389 : vector<8x16xf32>
    %392 = arith.mulf %388, %391 : vector<8x16xf32>
    %393 = arith.mulf %369, %392 : vector<8x16xf32>
    %394 = vector.extract_strided_slice %393 {offsets = [0, 15], sizes = [8, 1], strides = [1, 1]} : vector<8x16xf32> to vector<8x1xf32>
    %395 = vector.extract_strided_slice %393 {offsets = [0, 0], sizes = [8, 15], strides = [1, 1]} : vector<8x16xf32> to vector<8x15xf32>
    %396 = tpu.concatenate %394, %395 in 1 : vector<8x1xf32>, vector<8x15xf32> -> vector<8x16xf32>
    %397 = arith.addf %393, %396 : vector<8x16xf32>
    %398 = vector.extract_strided_slice %397 {offsets = [0, 14], sizes = [8, 2], strides = [1, 1]} : vector<8x16xf32> to vector<8x2xf32>
    %399 = vector.extract_strided_slice %397 {offsets = [0, 0], sizes = [8, 14], strides = [1, 1]} : vector<8x16xf32> to vector<8x14xf32>
    %400 = tpu.concatenate %398, %399 in 1 : vector<8x2xf32>, vector<8x14xf32> -> vector<8x16xf32>
    %401 = arith.addf %397, %400 : vector<8x16xf32>
    %cst_69 = arith.constant 0.000000e+00 : f32
    %402 = vector.broadcast %cst_69 : f32 to vector<8x16xf32>
    %403 = arith.select %79, %401, %402 : vector<8x16xi1>, vector<8x16xf32>
    %404 = vector.extract_strided_slice %403 {offsets = [0, 1], sizes = [8, 15], strides = [1, 1]} : vector<8x16xf32> to vector<8x15xf32>
    %405 = vector.extract_strided_slice %403 {offsets = [0, 0], sizes = [8, 1], strides = [1, 1]} : vector<8x16xf32> to vector<8x1xf32>
    %406 = tpu.concatenate %404, %405 in 1 : vector<8x15xf32>, vector<8x1xf32> -> vector<8x16xf32>
    %407 = arith.addf %403, %406 : vector<8x16xf32>
    %408 = vector.extract_strided_slice %403 {offsets = [0, 2], sizes = [8, 14], strides = [1, 1]} : vector<8x16xf32> to vector<8x14xf32>
    %409 = vector.extract_strided_slice %403 {offsets = [0, 0], sizes = [8, 2], strides = [1, 1]} : vector<8x16xf32> to vector<8x2xf32>
    %410 = tpu.concatenate %408, %409 in 1 : vector<8x14xf32>, vector<8x2xf32> -> vector<8x16xf32>
    %411 = arith.addf %407, %410 : vector<8x16xf32>
    %412 = vector.extract_strided_slice %403 {offsets = [0, 3], sizes = [8, 13], strides = [1, 1]} : vector<8x16xf32> to vector<8x13xf32>
    %413 = vector.extract_strided_slice %403 {offsets = [0, 0], sizes = [8, 3], strides = [1, 1]} : vector<8x16xf32> to vector<8x3xf32>
    %414 = tpu.concatenate %412, %413 in 1 : vector<8x13xf32>, vector<8x3xf32> -> vector<8x16xf32>
    %415 = arith.addf %411, %414 : vector<8x16xf32>
    %cst_70 = arith.constant 9.99999993E-9 : f32
    %416 = vector.broadcast %cst_70 : f32 to vector<8x16xf32>
    %417 = arith.maximumf %415, %416 : vector<8x16xf32>
    %418 = tpu.reciprocal %417 {approx = true} : vector<8x16xf32> -> vector<8x16xf32>
    %419 = arith.mulf %417, %418 : vector<8x16xf32>
    %cst_71 = arith.constant 2.000000e+00 : f32
    %420 = vector.broadcast %cst_71 : f32 to vector<8x16xf32>
    %421 = arith.subf %420, %419 : vector<8x16xf32>
    %422 = arith.mulf %418, %421 : vector<8x16xf32>
    %423 = arith.mulf %417, %422 : vector<8x16xf32>
    %cst_72 = arith.constant 2.000000e+00 : f32
    %424 = vector.broadcast %cst_72 : f32 to vector<8x16xf32>
    %425 = arith.subf %424, %423 : vector<8x16xf32>
    %426 = arith.mulf %422, %425 : vector<8x16xf32>
    %427 = arith.mulf %393, %426 : vector<8x16xf32>
    %428 = vector.extract_strided_slice %427 {offsets = [0, 12], sizes = [8, 4], strides = [1, 1]} : vector<8x16xf32> to vector<8x4xf32>
    %429 = vector.extract_strided_slice %427 {offsets = [0, 0], sizes = [8, 12], strides = [1, 1]} : vector<8x16xf32> to vector<8x12xf32>
    %430 = tpu.concatenate %428, %429 in 1 : vector<8x4xf32>, vector<8x12xf32> -> vector<8x16xf32>
    %431 = arith.addf %427, %430 : vector<8x16xf32>
    %432 = vector.extract_strided_slice %427 {offsets = [0, 8], sizes = [8, 8], strides = [1, 1]} : vector<8x16xf32> to vector<8x8xf32>
    %433 = vector.extract_strided_slice %427 {offsets = [0, 0], sizes = [8, 8], strides = [1, 1]} : vector<8x16xf32> to vector<8x8xf32>
    %434 = tpu.concatenate %432, %433 in 1 : vector<8x8xf32>, vector<8x8xf32> -> vector<8x16xf32>
    %435 = arith.addf %431, %434 : vector<8x16xf32>
    %436 = vector.extract_strided_slice %427 {offsets = [0, 4], sizes = [8, 12], strides = [1, 1]} : vector<8x16xf32> to vector<8x12xf32>
    %437 = vector.extract_strided_slice %427 {offsets = [0, 0], sizes = [8, 4], strides = [1, 1]} : vector<8x16xf32> to vector<8x4xf32>
    %438 = tpu.concatenate %436, %437 in 1 : vector<8x12xf32>, vector<8x4xf32> -> vector<8x16xf32>
    %439 = arith.addf %435, %438 : vector<8x16xf32>
    %cst_73 = arith.constant 9.99999993E-9 : f32
    %440 = vector.broadcast %cst_73 : f32 to vector<8x16xf32>
    %441 = arith.maximumf %439, %440 : vector<8x16xf32>
    %442 = tpu.reciprocal %441 {approx = true} : vector<8x16xf32> -> vector<8x16xf32>
    %443 = arith.mulf %441, %442 : vector<8x16xf32>
    %cst_74 = arith.constant 2.000000e+00 : f32
    %444 = vector.broadcast %cst_74 : f32 to vector<8x16xf32>
    %445 = arith.subf %444, %443 : vector<8x16xf32>
    %446 = arith.mulf %442, %445 : vector<8x16xf32>
    %447 = arith.mulf %441, %446 : vector<8x16xf32>
    %cst_75 = arith.constant 2.000000e+00 : f32
    %448 = vector.broadcast %cst_75 : f32 to vector<8x16xf32>
    %449 = arith.subf %448, %447 : vector<8x16xf32>
    %450 = arith.mulf %446, %449 : vector<8x16xf32>
    %451 = arith.mulf %427, %450 : vector<8x16xf32>
    %452 = vector.extract_strided_slice %451 {offsets = [0, 15], sizes = [8, 1], strides = [1, 1]} : vector<8x16xf32> to vector<8x1xf32>
    %453 = vector.extract_strided_slice %451 {offsets = [0, 0], sizes = [8, 15], strides = [1, 1]} : vector<8x16xf32> to vector<8x15xf32>
    %454 = tpu.concatenate %452, %453 in 1 : vector<8x1xf32>, vector<8x15xf32> -> vector<8x16xf32>
    %455 = arith.addf %451, %454 : vector<8x16xf32>
    %456 = vector.extract_strided_slice %455 {offsets = [0, 14], sizes = [8, 2], strides = [1, 1]} : vector<8x16xf32> to vector<8x2xf32>
    %457 = vector.extract_strided_slice %455 {offsets = [0, 0], sizes = [8, 14], strides = [1, 1]} : vector<8x16xf32> to vector<8x14xf32>
    %458 = tpu.concatenate %456, %457 in 1 : vector<8x2xf32>, vector<8x14xf32> -> vector<8x16xf32>
    %459 = arith.addf %455, %458 : vector<8x16xf32>
    %cst_76 = arith.constant 0.000000e+00 : f32
    %460 = vector.broadcast %cst_76 : f32 to vector<8x16xf32>
    %461 = arith.select %79, %459, %460 : vector<8x16xi1>, vector<8x16xf32>
    %462 = vector.extract_strided_slice %461 {offsets = [0, 1], sizes = [8, 15], strides = [1, 1]} : vector<8x16xf32> to vector<8x15xf32>
    %463 = vector.extract_strided_slice %461 {offsets = [0, 0], sizes = [8, 1], strides = [1, 1]} : vector<8x16xf32> to vector<8x1xf32>
    %464 = tpu.concatenate %462, %463 in 1 : vector<8x15xf32>, vector<8x1xf32> -> vector<8x16xf32>
    %465 = arith.addf %461, %464 : vector<8x16xf32>
    %466 = vector.extract_strided_slice %461 {offsets = [0, 2], sizes = [8, 14], strides = [1, 1]} : vector<8x16xf32> to vector<8x14xf32>
    %467 = vector.extract_strided_slice %461 {offsets = [0, 0], sizes = [8, 2], strides = [1, 1]} : vector<8x16xf32> to vector<8x2xf32>
    %468 = tpu.concatenate %466, %467 in 1 : vector<8x14xf32>, vector<8x2xf32> -> vector<8x16xf32>
    %469 = arith.addf %465, %468 : vector<8x16xf32>
    %470 = vector.extract_strided_slice %461 {offsets = [0, 3], sizes = [8, 13], strides = [1, 1]} : vector<8x16xf32> to vector<8x13xf32>
    %471 = vector.extract_strided_slice %461 {offsets = [0, 0], sizes = [8, 3], strides = [1, 1]} : vector<8x16xf32> to vector<8x3xf32>
    %472 = tpu.concatenate %470, %471 in 1 : vector<8x13xf32>, vector<8x3xf32> -> vector<8x16xf32>
    %473 = arith.addf %469, %472 : vector<8x16xf32>
    %cst_77 = arith.constant 9.99999993E-9 : f32
    %474 = vector.broadcast %cst_77 : f32 to vector<8x16xf32>
    %475 = arith.maximumf %473, %474 : vector<8x16xf32>
    %476 = tpu.reciprocal %475 {approx = true} : vector<8x16xf32> -> vector<8x16xf32>
    %477 = arith.mulf %475, %476 : vector<8x16xf32>
    %cst_78 = arith.constant 2.000000e+00 : f32
    %478 = vector.broadcast %cst_78 : f32 to vector<8x16xf32>
    %479 = arith.subf %478, %477 : vector<8x16xf32>
    %480 = arith.mulf %476, %479 : vector<8x16xf32>
    %481 = arith.mulf %475, %480 : vector<8x16xf32>
    %cst_79 = arith.constant 2.000000e+00 : f32
    %482 = vector.broadcast %cst_79 : f32 to vector<8x16xf32>
    %483 = arith.subf %482, %481 : vector<8x16xf32>
    %484 = arith.mulf %480, %483 : vector<8x16xf32>
    %485 = arith.mulf %451, %484 : vector<8x16xf32>
    %486 = vector.extract_strided_slice %485 {offsets = [0, 12], sizes = [8, 4], strides = [1, 1]} : vector<8x16xf32> to vector<8x4xf32>
    %487 = vector.extract_strided_slice %485 {offsets = [0, 0], sizes = [8, 12], strides = [1, 1]} : vector<8x16xf32> to vector<8x12xf32>
    %488 = tpu.concatenate %486, %487 in 1 : vector<8x4xf32>, vector<8x12xf32> -> vector<8x16xf32>
    %489 = arith.addf %485, %488 : vector<8x16xf32>
    %490 = vector.extract_strided_slice %485 {offsets = [0, 8], sizes = [8, 8], strides = [1, 1]} : vector<8x16xf32> to vector<8x8xf32>
    %491 = vector.extract_strided_slice %485 {offsets = [0, 0], sizes = [8, 8], strides = [1, 1]} : vector<8x16xf32> to vector<8x8xf32>
    %492 = tpu.concatenate %490, %491 in 1 : vector<8x8xf32>, vector<8x8xf32> -> vector<8x16xf32>
    %493 = arith.addf %489, %492 : vector<8x16xf32>
    %494 = vector.extract_strided_slice %485 {offsets = [0, 4], sizes = [8, 12], strides = [1, 1]} : vector<8x16xf32> to vector<8x12xf32>
    %495 = vector.extract_strided_slice %485 {offsets = [0, 0], sizes = [8, 4], strides = [1, 1]} : vector<8x16xf32> to vector<8x4xf32>
    %496 = tpu.concatenate %494, %495 in 1 : vector<8x12xf32>, vector<8x4xf32> -> vector<8x16xf32>
    %497 = arith.addf %493, %496 : vector<8x16xf32>
    %cst_80 = arith.constant 9.99999993E-9 : f32
    %498 = vector.broadcast %cst_80 : f32 to vector<8x16xf32>
    %499 = arith.maximumf %497, %498 : vector<8x16xf32>
    %500 = tpu.reciprocal %499 {approx = true} : vector<8x16xf32> -> vector<8x16xf32>
    %501 = arith.mulf %499, %500 : vector<8x16xf32>
    %cst_81 = arith.constant 2.000000e+00 : f32
    %502 = vector.broadcast %cst_81 : f32 to vector<8x16xf32>
    %503 = arith.subf %502, %501 : vector<8x16xf32>
    %504 = arith.mulf %500, %503 : vector<8x16xf32>
    %505 = arith.mulf %499, %504 : vector<8x16xf32>
    %cst_82 = arith.constant 2.000000e+00 : f32
    %506 = vector.broadcast %cst_82 : f32 to vector<8x16xf32>
    %507 = arith.subf %506, %505 : vector<8x16xf32>
    %508 = arith.mulf %504, %507 : vector<8x16xf32>
    %509 = arith.mulf %485, %508 : vector<8x16xf32>
    %510 = vector.extract_strided_slice %509 {offsets = [0, 15], sizes = [8, 1], strides = [1, 1]} : vector<8x16xf32> to vector<8x1xf32>
    %511 = vector.extract_strided_slice %509 {offsets = [0, 0], sizes = [8, 15], strides = [1, 1]} : vector<8x16xf32> to vector<8x15xf32>
    %512 = tpu.concatenate %510, %511 in 1 : vector<8x1xf32>, vector<8x15xf32> -> vector<8x16xf32>
    %513 = arith.addf %509, %512 : vector<8x16xf32>
    %514 = vector.extract_strided_slice %513 {offsets = [0, 14], sizes = [8, 2], strides = [1, 1]} : vector<8x16xf32> to vector<8x2xf32>
    %515 = vector.extract_strided_slice %513 {offsets = [0, 0], sizes = [8, 14], strides = [1, 1]} : vector<8x16xf32> to vector<8x14xf32>
    %516 = tpu.concatenate %514, %515 in 1 : vector<8x2xf32>, vector<8x14xf32> -> vector<8x16xf32>
    %517 = arith.addf %513, %516 : vector<8x16xf32>
    %cst_83 = arith.constant 0.000000e+00 : f32
    %518 = vector.broadcast %cst_83 : f32 to vector<8x16xf32>
    %519 = arith.select %79, %517, %518 : vector<8x16xi1>, vector<8x16xf32>
    %520 = vector.extract_strided_slice %519 {offsets = [0, 1], sizes = [8, 15], strides = [1, 1]} : vector<8x16xf32> to vector<8x15xf32>
    %521 = vector.extract_strided_slice %519 {offsets = [0, 0], sizes = [8, 1], strides = [1, 1]} : vector<8x16xf32> to vector<8x1xf32>
    %522 = tpu.concatenate %520, %521 in 1 : vector<8x15xf32>, vector<8x1xf32> -> vector<8x16xf32>
    %523 = arith.addf %519, %522 : vector<8x16xf32>
    %524 = vector.extract_strided_slice %519 {offsets = [0, 2], sizes = [8, 14], strides = [1, 1]} : vector<8x16xf32> to vector<8x14xf32>
    %525 = vector.extract_strided_slice %519 {offsets = [0, 0], sizes = [8, 2], strides = [1, 1]} : vector<8x16xf32> to vector<8x2xf32>
    %526 = tpu.concatenate %524, %525 in 1 : vector<8x14xf32>, vector<8x2xf32> -> vector<8x16xf32>
    %527 = arith.addf %523, %526 : vector<8x16xf32>
    %528 = vector.extract_strided_slice %519 {offsets = [0, 3], sizes = [8, 13], strides = [1, 1]} : vector<8x16xf32> to vector<8x13xf32>
    %529 = vector.extract_strided_slice %519 {offsets = [0, 0], sizes = [8, 3], strides = [1, 1]} : vector<8x16xf32> to vector<8x3xf32>
    %530 = tpu.concatenate %528, %529 in 1 : vector<8x13xf32>, vector<8x3xf32> -> vector<8x16xf32>
    %531 = arith.addf %527, %530 : vector<8x16xf32>
    %cst_84 = arith.constant 9.99999993E-9 : f32
    %532 = vector.broadcast %cst_84 : f32 to vector<8x16xf32>
    %533 = arith.maximumf %531, %532 : vector<8x16xf32>
    %534 = tpu.reciprocal %533 {approx = true} : vector<8x16xf32> -> vector<8x16xf32>
    %535 = arith.mulf %533, %534 : vector<8x16xf32>
    %cst_85 = arith.constant 2.000000e+00 : f32
    %536 = vector.broadcast %cst_85 : f32 to vector<8x16xf32>
    %537 = arith.subf %536, %535 : vector<8x16xf32>
    %538 = arith.mulf %534, %537 : vector<8x16xf32>
    %539 = arith.mulf %533, %538 : vector<8x16xf32>
    %cst_86 = arith.constant 2.000000e+00 : f32
    %540 = vector.broadcast %cst_86 : f32 to vector<8x16xf32>
    %541 = arith.subf %540, %539 : vector<8x16xf32>
    %542 = arith.mulf %538, %541 : vector<8x16xf32>
    %543 = arith.mulf %509, %542 : vector<8x16xf32>
    %544 = vector.extract_strided_slice %543 {offsets = [0, 12], sizes = [8, 4], strides = [1, 1]} : vector<8x16xf32> to vector<8x4xf32>
    %545 = vector.extract_strided_slice %543 {offsets = [0, 0], sizes = [8, 12], strides = [1, 1]} : vector<8x16xf32> to vector<8x12xf32>
    %546 = tpu.concatenate %544, %545 in 1 : vector<8x4xf32>, vector<8x12xf32> -> vector<8x16xf32>
    %547 = arith.addf %543, %546 : vector<8x16xf32>
    %548 = vector.extract_strided_slice %543 {offsets = [0, 8], sizes = [8, 8], strides = [1, 1]} : vector<8x16xf32> to vector<8x8xf32>
    %549 = vector.extract_strided_slice %543 {offsets = [0, 0], sizes = [8, 8], strides = [1, 1]} : vector<8x16xf32> to vector<8x8xf32>
    %550 = tpu.concatenate %548, %549 in 1 : vector<8x8xf32>, vector<8x8xf32> -> vector<8x16xf32>
    %551 = arith.addf %547, %550 : vector<8x16xf32>
    %552 = vector.extract_strided_slice %543 {offsets = [0, 4], sizes = [8, 12], strides = [1, 1]} : vector<8x16xf32> to vector<8x12xf32>
    %553 = vector.extract_strided_slice %543 {offsets = [0, 0], sizes = [8, 4], strides = [1, 1]} : vector<8x16xf32> to vector<8x4xf32>
    %554 = tpu.concatenate %552, %553 in 1 : vector<8x12xf32>, vector<8x4xf32> -> vector<8x16xf32>
    %555 = arith.addf %551, %554 : vector<8x16xf32>
    %cst_87 = arith.constant 9.99999993E-9 : f32
    %556 = vector.broadcast %cst_87 : f32 to vector<8x16xf32>
    %557 = arith.maximumf %555, %556 : vector<8x16xf32>
    %558 = tpu.reciprocal %557 {approx = true} : vector<8x16xf32> -> vector<8x16xf32>
    %559 = arith.mulf %557, %558 : vector<8x16xf32>
    %cst_88 = arith.constant 2.000000e+00 : f32
    %560 = vector.broadcast %cst_88 : f32 to vector<8x16xf32>
    %561 = arith.subf %560, %559 : vector<8x16xf32>
    %562 = arith.mulf %558, %561 : vector<8x16xf32>
    %563 = arith.mulf %557, %562 : vector<8x16xf32>
    %cst_89 = arith.constant 2.000000e+00 : f32
    %564 = vector.broadcast %cst_89 : f32 to vector<8x16xf32>
    %565 = arith.subf %564, %563 : vector<8x16xf32>
    %566 = arith.mulf %562, %565 : vector<8x16xf32>
    %567 = arith.mulf %543, %566 : vector<8x16xf32>
    %568 = vector.extract_strided_slice %567 {offsets = [0, 15], sizes = [8, 1], strides = [1, 1]} : vector<8x16xf32> to vector<8x1xf32>
    %569 = vector.extract_strided_slice %567 {offsets = [0, 0], sizes = [8, 15], strides = [1, 1]} : vector<8x16xf32> to vector<8x15xf32>
    %570 = tpu.concatenate %568, %569 in 1 : vector<8x1xf32>, vector<8x15xf32> -> vector<8x16xf32>
    %571 = arith.addf %567, %570 : vector<8x16xf32>
    %572 = vector.extract_strided_slice %571 {offsets = [0, 14], sizes = [8, 2], strides = [1, 1]} : vector<8x16xf32> to vector<8x2xf32>
    %573 = vector.extract_strided_slice %571 {offsets = [0, 0], sizes = [8, 14], strides = [1, 1]} : vector<8x16xf32> to vector<8x14xf32>
    %574 = tpu.concatenate %572, %573 in 1 : vector<8x2xf32>, vector<8x14xf32> -> vector<8x16xf32>
    %575 = arith.addf %571, %574 : vector<8x16xf32>
    %cst_90 = arith.constant 0.000000e+00 : f32
    %576 = vector.broadcast %cst_90 : f32 to vector<8x16xf32>
    %577 = arith.select %79, %575, %576 : vector<8x16xi1>, vector<8x16xf32>
    %578 = vector.extract_strided_slice %577 {offsets = [0, 1], sizes = [8, 15], strides = [1, 1]} : vector<8x16xf32> to vector<8x15xf32>
    %579 = vector.extract_strided_slice %577 {offsets = [0, 0], sizes = [8, 1], strides = [1, 1]} : vector<8x16xf32> to vector<8x1xf32>
    %580 = tpu.concatenate %578, %579 in 1 : vector<8x15xf32>, vector<8x1xf32> -> vector<8x16xf32>
    %581 = arith.addf %577, %580 : vector<8x16xf32>
    %582 = vector.extract_strided_slice %577 {offsets = [0, 2], sizes = [8, 14], strides = [1, 1]} : vector<8x16xf32> to vector<8x14xf32>
    %583 = vector.extract_strided_slice %577 {offsets = [0, 0], sizes = [8, 2], strides = [1, 1]} : vector<8x16xf32> to vector<8x2xf32>
    %584 = tpu.concatenate %582, %583 in 1 : vector<8x14xf32>, vector<8x2xf32> -> vector<8x16xf32>
    %585 = arith.addf %581, %584 : vector<8x16xf32>
    %586 = vector.extract_strided_slice %577 {offsets = [0, 3], sizes = [8, 13], strides = [1, 1]} : vector<8x16xf32> to vector<8x13xf32>
    %587 = vector.extract_strided_slice %577 {offsets = [0, 0], sizes = [8, 3], strides = [1, 1]} : vector<8x16xf32> to vector<8x3xf32>
    %588 = tpu.concatenate %586, %587 in 1 : vector<8x13xf32>, vector<8x3xf32> -> vector<8x16xf32>
    %589 = arith.addf %585, %588 : vector<8x16xf32>
    %cst_91 = arith.constant 9.99999993E-9 : f32
    %590 = vector.broadcast %cst_91 : f32 to vector<8x16xf32>
    %591 = arith.maximumf %589, %590 : vector<8x16xf32>
    %592 = tpu.reciprocal %591 {approx = true} : vector<8x16xf32> -> vector<8x16xf32>
    %593 = arith.mulf %591, %592 : vector<8x16xf32>
    %cst_92 = arith.constant 2.000000e+00 : f32
    %594 = vector.broadcast %cst_92 : f32 to vector<8x16xf32>
    %595 = arith.subf %594, %593 : vector<8x16xf32>
    %596 = arith.mulf %592, %595 : vector<8x16xf32>
    %597 = arith.mulf %591, %596 : vector<8x16xf32>
    %cst_93 = arith.constant 2.000000e+00 : f32
    %598 = vector.broadcast %cst_93 : f32 to vector<8x16xf32>
    %599 = arith.subf %598, %597 : vector<8x16xf32>
    %600 = arith.mulf %596, %599 : vector<8x16xf32>
    %601 = arith.mulf %567, %600 : vector<8x16xf32>
    %602 = vector.extract_strided_slice %601 {offsets = [0, 12], sizes = [8, 4], strides = [1, 1]} : vector<8x16xf32> to vector<8x4xf32>
    %603 = vector.extract_strided_slice %601 {offsets = [0, 0], sizes = [8, 12], strides = [1, 1]} : vector<8x16xf32> to vector<8x12xf32>
    %604 = tpu.concatenate %602, %603 in 1 : vector<8x4xf32>, vector<8x12xf32> -> vector<8x16xf32>
    %605 = arith.addf %601, %604 : vector<8x16xf32>
    %606 = vector.extract_strided_slice %601 {offsets = [0, 8], sizes = [8, 8], strides = [1, 1]} : vector<8x16xf32> to vector<8x8xf32>
    %607 = vector.extract_strided_slice %601 {offsets = [0, 0], sizes = [8, 8], strides = [1, 1]} : vector<8x16xf32> to vector<8x8xf32>
    %608 = tpu.concatenate %606, %607 in 1 : vector<8x8xf32>, vector<8x8xf32> -> vector<8x16xf32>
    %609 = arith.addf %605, %608 : vector<8x16xf32>
    %610 = vector.extract_strided_slice %601 {offsets = [0, 4], sizes = [8, 12], strides = [1, 1]} : vector<8x16xf32> to vector<8x12xf32>
    %611 = vector.extract_strided_slice %601 {offsets = [0, 0], sizes = [8, 4], strides = [1, 1]} : vector<8x16xf32> to vector<8x4xf32>
    %612 = tpu.concatenate %610, %611 in 1 : vector<8x12xf32>, vector<8x4xf32> -> vector<8x16xf32>
    %613 = arith.addf %609, %612 : vector<8x16xf32>
    %cst_94 = arith.constant 9.99999993E-9 : f32
    %614 = vector.broadcast %cst_94 : f32 to vector<8x16xf32>
    %615 = arith.maximumf %613, %614 : vector<8x16xf32>
    %616 = tpu.reciprocal %615 {approx = true} : vector<8x16xf32> -> vector<8x16xf32>
    %617 = arith.mulf %615, %616 : vector<8x16xf32>
    %cst_95 = arith.constant 2.000000e+00 : f32
    %618 = vector.broadcast %cst_95 : f32 to vector<8x16xf32>
    %619 = arith.subf %618, %617 : vector<8x16xf32>
    %620 = arith.mulf %616, %619 : vector<8x16xf32>
    %621 = arith.mulf %615, %620 : vector<8x16xf32>
    %cst_96 = arith.constant 2.000000e+00 : f32
    %622 = vector.broadcast %cst_96 : f32 to vector<8x16xf32>
    %623 = arith.subf %622, %621 : vector<8x16xf32>
    %624 = arith.mulf %620, %623 : vector<8x16xf32>
    %625 = arith.mulf %601, %624 : vector<8x16xf32>
    %626 = vector.extract_strided_slice %625 {offsets = [0, 15], sizes = [8, 1], strides = [1, 1]} : vector<8x16xf32> to vector<8x1xf32>
    %627 = vector.extract_strided_slice %625 {offsets = [0, 0], sizes = [8, 15], strides = [1, 1]} : vector<8x16xf32> to vector<8x15xf32>
    %628 = tpu.concatenate %626, %627 in 1 : vector<8x1xf32>, vector<8x15xf32> -> vector<8x16xf32>
    %629 = arith.addf %625, %628 : vector<8x16xf32>
    %630 = vector.extract_strided_slice %629 {offsets = [0, 14], sizes = [8, 2], strides = [1, 1]} : vector<8x16xf32> to vector<8x2xf32>
    %631 = vector.extract_strided_slice %629 {offsets = [0, 0], sizes = [8, 14], strides = [1, 1]} : vector<8x16xf32> to vector<8x14xf32>
    %632 = tpu.concatenate %630, %631 in 1 : vector<8x2xf32>, vector<8x14xf32> -> vector<8x16xf32>
    %633 = arith.addf %629, %632 : vector<8x16xf32>
    %cst_97 = arith.constant 0.000000e+00 : f32
    %634 = vector.broadcast %cst_97 : f32 to vector<8x16xf32>
    %635 = arith.select %79, %633, %634 : vector<8x16xi1>, vector<8x16xf32>
    %636 = vector.extract_strided_slice %635 {offsets = [0, 1], sizes = [8, 15], strides = [1, 1]} : vector<8x16xf32> to vector<8x15xf32>
    %637 = vector.extract_strided_slice %635 {offsets = [0, 0], sizes = [8, 1], strides = [1, 1]} : vector<8x16xf32> to vector<8x1xf32>
    %638 = tpu.concatenate %636, %637 in 1 : vector<8x15xf32>, vector<8x1xf32> -> vector<8x16xf32>
    %639 = arith.addf %635, %638 : vector<8x16xf32>
    %640 = vector.extract_strided_slice %635 {offsets = [0, 2], sizes = [8, 14], strides = [1, 1]} : vector<8x16xf32> to vector<8x14xf32>
    %641 = vector.extract_strided_slice %635 {offsets = [0, 0], sizes = [8, 2], strides = [1, 1]} : vector<8x16xf32> to vector<8x2xf32>
    %642 = tpu.concatenate %640, %641 in 1 : vector<8x14xf32>, vector<8x2xf32> -> vector<8x16xf32>
    %643 = arith.addf %639, %642 : vector<8x16xf32>
    %644 = vector.extract_strided_slice %635 {offsets = [0, 3], sizes = [8, 13], strides = [1, 1]} : vector<8x16xf32> to vector<8x13xf32>
    %645 = vector.extract_strided_slice %635 {offsets = [0, 0], sizes = [8, 3], strides = [1, 1]} : vector<8x16xf32> to vector<8x3xf32>
    %646 = tpu.concatenate %644, %645 in 1 : vector<8x13xf32>, vector<8x3xf32> -> vector<8x16xf32>
    %647 = arith.addf %643, %646 : vector<8x16xf32>
    %cst_98 = arith.constant 9.99999993E-9 : f32
    %648 = vector.broadcast %cst_98 : f32 to vector<8x16xf32>
    %649 = arith.maximumf %647, %648 : vector<8x16xf32>
    %650 = tpu.reciprocal %649 {approx = true} : vector<8x16xf32> -> vector<8x16xf32>
    %651 = arith.mulf %649, %650 : vector<8x16xf32>
    %cst_99 = arith.constant 2.000000e+00 : f32
    %652 = vector.broadcast %cst_99 : f32 to vector<8x16xf32>
    %653 = arith.subf %652, %651 : vector<8x16xf32>
    %654 = arith.mulf %650, %653 : vector<8x16xf32>
    %655 = arith.mulf %649, %654 : vector<8x16xf32>
    %cst_100 = arith.constant 2.000000e+00 : f32
    %656 = vector.broadcast %cst_100 : f32 to vector<8x16xf32>
    %657 = arith.subf %656, %655 : vector<8x16xf32>
    %658 = arith.mulf %654, %657 : vector<8x16xf32>
    %659 = arith.mulf %625, %658 : vector<8x16xf32>
    %c0_101 = arith.constant 0 : index
    %c0_102 = arith.constant 0 : index
    %660 = vector.load %arg4[%c0_101, %c0_102] : memref<8x16xf32, #tpu.memory_space<vmem>>, vector<8x16xf32>
    tpu.vector_store %arg4[%c0_101, %c0_102], %659 {strides = array<i32>} : memref<8x16xf32, #tpu.memory_space<vmem>>, vector<8x16xf32>,
    return
  }
  func.func @transform_0(%arg0: i32) -> (i32, i32) {
    %c0_i32 = arith.constant 0 : i32
    %c0_i32_0 = arith.constant 0 : i32
    return %arg0, %c0_i32 : i32, i32
  }
  func.func @transform_1(%arg0: i32) -> (i32, i32, i32) {
    %c0_i32 = arith.constant 0 : i32
    %c0_i32_0 = arith.constant 0 : i32
    %c0_i32_1 = arith.constant 0 : i32
    %c0_i32_2 = arith.constant 0 : i32
    return %c0_i32, %c0_i32_0, %c0_i32_1 : i32, i32, i32
  }
  func.func @transform_2(%arg0: i32) -> (i32, i32) {
    %c0_i32 = arith.constant 0 : i32
    %c0_i32_0 = arith.constant 0 : i32
    %c0_i32_1 = arith.constant 0 : i32
    return %c0_i32, %c0_i32_0 : i32, i32
  }
  func.func @transform_3(%arg0: i32) -> (i32, i32) {
    %c0_i32 = arith.constant 0 : i32
    %c0_i32_0 = arith.constant 0 : i32
    return %arg0, %c0_i32 : i32, i32
  }
}

</mosaic_0001>

<bundles_post_ra>
// kernel: matching_net_forward.1
= control target key start
LH: loop header
LB: loop body
LE: loop exit
PB: predicated region body
PF: predicated region fallthrough
CT: control target
= control target key end

     0   :  { %8 = vsyncpa [#allocation3], 0  ;;  %s1571_s12 = smov [#allocation2]   ;;  %s1932_s0 = inlined_call_operand.vmem [shape: f32[8,32], index: 0, kind: input, shape index: {}]   ;;  %s1933_s1 = inlined_call_operand.hbm [shape: f32[5,32,32], index: 1, kind: input, shape index: {}]   ;;  %s1934_s2 = inlined_call_operand.vmem [shape: f32[5,32], index: 2, kind: input, shape index: {}]   ;;  %s1935_s3 = inlined_call_operand.vmem [shape: f32[8,16], index: 3, kind: output, shape index: {}]  }
   0x1   :  { %s16_s13 = sshll.u32 %s1571_s12, 4  ;;  %s1547_s16 = scalar_lea.hbm %s1933_s1, 2560  ;;  %s17_s13 = int_to_ptr.vmem [resolvable:$true] %s16_s13 }
   0x2   :  { %p1548_p0 = scmp.ne.s32.totalorder %s1933_s1, %s1547_s16  ;;  %p1551_p1 = scmp.lt.u32.totalorder %s1547_s16, %s1933_s1 }
   0x4   :  { %p1553_p2 = pnand %p1551_p1, %p1548_p0 }
   0x6   :  { %1556 = shalt.err (!%p1553_p2)
}
   0x7   :  { %s1557_s21 = scalar_lea.vmem %s17_s13, 2560  ;;  %p1562_p4 = scmp.lt.s32.totalorder %s17_s13, %s17_s13 }
   0x8   :  { %p1558_p3 = scmp.ne.s32.totalorder %s17_s13, %s1557_s21  ;;  %p1563_p5 = scmp.lt.s32.totalorder %s1557_s21, %s1557_s21 }
   0xa   :  { %p1564_p6 = por %p1563_p5, %p1562_p4 }
   0xc   :  { %p1565_p7 = pnand %p1564_p6, %p1558_p3 }
   0xe   :  { %1568 = shalt.err (!%p1565_p7)
}
   0xf   :  { %s1572_s22 = smov 128   ;;  %s1573_s23 = smov 8  }
  0x10   :  { %22 = dma.hbm_to_vmem [thread:$0]  %s1933_s1, 2560, %s17_s13, [#allocation3], %s1572_s22, %s1572_s22, %s1573_s23  }
  0x11   :  { %1569 = dma.done.wait [#allocation3], 2560  }
  0x12   :  { %1570 = vsyncadd [#allocation3], 4294964736  ;;  %v1574_v0 = vmov 0.0|0.0   ;;  %vm1575_vm0 = vmmov 0   ;;  %v1576_v1 = vmov 0.0   ;;  %v30_v2 = vld [vmem:[#allocation2] sm:$0xff]  ;;  %v34_v18 = vlaneseq }
  0x13   :  { %1452 = vmatprep.subr.bf16.mxu0 %v1574_v0  ;;  %1405 = vmatprep.mubr.msk.f32.mxu0 %vm1575_vm0, %v1576_v1  ;;  %v31_v3 = vld [vmem:[#allocation2 + $0x8] sm:$0xff]  ;;  %v32_v4 = vld [vmem:[#allocation2 + $0x10] sm:$0xff]  ;;  %v33_v6 = vld [vmem:[#allocation2 + $0x18] sm:$0xff]  ;;  %vm38_vm1 = vcmask 261120   ;;  %s1578_s28 = smov 116   ;;  %s1579_s29 = smov 4  }
  0x14   :  { %1458 = vmatprep.subr.bf16.mxu1 %v1574_v0  ;;  %1416 = vmatprep.mubr.msk.f32.mxu1 %vm1575_vm0, %v1576_v1  ;;  %v1453_v5 = vpack.c.bf16 %v31_v3, %v30_v2  ;;  %v116_v7 = vld [vmem:[#allocation2 + $0x20] sm:$0xff]  ;;  %v117_v8 = vld [vmem:[#allocation2 + $0x28] sm:$0xff]  ;;  %v1456_v9 = vpack.c.bf16 %v33_v6, %v32_v4  ;;  %v118_v12 = vld [vmem:[#allocation2 + $0x30] sm:$0xff]  ;;  %v1643_v19 = vshrl.u32 %v34_v18, 7  ;;  %s1580_s30 = smov 12   ;;  %s1581_s4 = smov 124  }
  0x15   :  { %v1459_v10 = vpack.c.bf16 %v117_v8, %v116_v7  ;;  %v29_v11 = vld [vmem:[%s1932_s0] sm:$0xff]  ;;  %v119_v13 = vld [vmem:[#allocation2 + $0x38] sm:$0xff]  ;;  %v202_v16 = vld [vmem:[#allocation2 + $0x48] sm:$0xff]  ;;  %vm489_vm7 = vcmask 31744   ;;  %vm498_vm8 = vcmask 64512   ;;  %vm507_vm9 = vcmask 97280  }
  0x16   :  { %1454 = vmatpush3.bf16.msra.mxu0 %v1453_v5  ;;  %v1462_v14 = vpack.c.bf16 %v119_v13, %v118_v12  ;;  %v201_v15 = vld [vmem:[#allocation2 + $0x40] sm:$0xff]  ;;  %v36_v20 = vsub.s32 0, %v1643_v19  ;;  %v203_v28 = vld [vmem:[#allocation2 + $0x50] sm:$0xff]  ;;  %v204_v29 = vld [vmem:[#allocation2 + $0x58] sm:$0xff]  ;;  %v122_v34 = vsub.s32 1, %v1643_v19  ;;  %v207_v47 = vsub.s32 2, %v1643_v19 }
  0x17   :  { %1455 = vmatprep.subr.bf16.mxu0 %v1574_v0  ;;  %1460 = vmatpush3.bf16.msra.mxu1 %v1459_v10  ;;  %v1465_v17 = vpack.c.bf16 %v202_v16, %v201_v15  ;;  %v28_v21 = vld [vmem:[%s1934_s2] sm:$0x1f]  ;;  %v1468_v30 = vpack.c.bf16 %v204_v29, %v203_v28  ;;  %v287_v32 = vld [vmem:[#allocation2 + $0x68] sm:$0xff]  ;;  %v288_v41 = vld [vmem:[#allocation2 + $0x70] sm:$0xff]  ;;  %v292_v57 = vsub.s32 3, %v1643_v19  ;;  %s1577_s2 = smov 120  }
  0x18   :  { %1461 = vmatprep.subr.bf16.mxu1 %v1574_v0  ;;  %v37_v22 = vrot.slane %v28_v21, %v36_v20  ;;  %v286_v31 = vld [vmem:[#allocation2 + $0x60] sm:$0xff]  ;;  %v123_v35 = vrot.slane %v28_v21, %v122_v34  ;;  %v289_v42 = vld [vmem:[#allocation2 + $0x78] sm:$0xff]  ;;  %v372_v45 = vld [vmem:[#allocation2 + $0x88] sm:$0xff]  ;;  %v208_v48 = vrot.slane %v28_v21, %v207_v47  ;;  %s1582_s5 = smov 1   ;;  %s1583_s6 = smov 113   ;;  %vm526_vm10 = vcmask 7168  }
  0x19   :  { %v1471_v33 = vpack.c.bf16 %v287_v32, %v286_v31  ;;  %v1474_v43 = vpack.c.bf16 %v289_v42, %v288_v41  ;;  %v371_v44 = vld [vmem:[#allocation2 + $0x80] sm:$0xff]  ;;  %v373_v54 = vld [vmem:[#allocation2 + $0x90] sm:$0xff]  ;;  %v374_v55 = vld [vmem:[#allocation2 + $0x98] sm:$0xff]  ;;  %v293_v58 = vrot.slane %v28_v21, %v292_v57  ;;  %s1584_s7 = smov 2   ;;  %s1585_s8 = smov 114   ;;  %vm536_vm11 = vcmask 15360  }
  0x1a   :  { %1457 = vmatpush3.bf16.msra.mxu0 %v1456_v9  ;;  %v1477_v46 = vpack.c.bf16 %v372_v45, %v371_v44  ;;  %v1480_v56 = vpack.c.bf16 %v374_v55, %v373_v54  ;;  %v468_v45 = vand.u32 127, %v34_v18  ;;  %s1586_s9 = smov 15   ;;  %s1587_s10 = smov 127   ;;  %vm547_vm13 = vcmask 121856  }
  0x1b   :  { %1464 = vmatprep.subr.bf16.mxu0 %v1574_v0  ;;  %1463 = vmatpush3.bf16.msra.mxu1 %v1462_v14  ;;  %s1588_s11 = smov 14   ;;  %s1589_s12 = smov 126   ;;  %vm556_vm14 = vcmask 113664   ;;  %vm565_vm15 = vcmask 105472  }
  0x1c   :  { %1470 = vmatprep.subr.bf16.mxu1 %v1574_v0  ;;  %s1590_s13 = smov 13   ;;  %s1591_s14 = smov 125  }
  0x1d   :  { %1406 = vmatmul.mubr.msk.f32.vlgmr.msra.gmra.mrb[0].mxu0 %vm38_vm1, %v29_v11 }
  0x1e   :  { %1427 = vmatprep.mubr.msk.f32.mxu0 %vm1575_vm0, %v1576_v1  ;;  %1466 = vmatpush3.bf16.msra.mxu0 %v1465_v17 }
  0x1f   :  { %1467 = vmatprep.subr.bf16.mxu0 %v1574_v0 }
  0x22   :  { %1469 = vmatpush3.bf16.msra.mxu0 %v1468_v30 }
  0x23   :  { %1476 = vmatprep.subr.bf16.mxu0 %v1574_v0 }
  0xf0   :  { %v108_v23 = vpop.f32.mrb[0].mxu0 }
  0xf1   :  { %v109_v24 = vadd.f32 %v108_v23, %v37_v22  ;;  %v1407_v25 = vpop.f32.mrb[1].mxu0 }
  0xf3   :  { %vm112_vm2 = vcmp.gt.f32.partialorder %v109_v24, 0.0  ;;  %v113_v26 = vmul.f32 0.01, %v109_v24 }
  0xf5   :  { %v114_v27 = vsel %vm112_vm2, %v109_v24, %v113_v26 }
  0xf6   :  { %1417 = vmatmul.mubr.msk.f32.vlgmr.msra.gmra.mrb[0].mxu1 %vm38_vm1, %v114_v27 }
  0xf7   :  { %1438 = vmatprep.mubr.msk.f32.mxu1 %vm1575_vm0, %v1576_v1  ;;  %1472 = vmatpush3.bf16.msra.mxu1 %v1471_v33 }
  0xf8   :  { %1473 = vmatprep.subr.bf16.mxu1 %v1574_v0 }
  0xfb   :  { %1475 = vmatpush3.bf16.msra.mxu1 %v1474_v43 }
 0x1c9   :  { %v193_v36 = vpop.f32.mrb[0].mxu1 }
 0x1ca   :  { %v194_v37 = vadd.f32 %v193_v36, %v123_v35  ;;  %v1418_v38 = vpop.f32.mrb[1].mxu1 }
 0x1cc   :  { %vm197_vm3 = vcmp.gt.f32.partialorder %v194_v37, 0.0  ;;  %v198_v39 = vmul.f32 0.01, %v194_v37 }
 0x1ce   :  { %v199_v40 = vsel %vm197_vm3, %v194_v37, %v198_v39 }
 0x1cf   :  { %1428 = vmatmul.mubr.msk.f32.vlgmr.msra.gmra.mrb[2].mxu0 %vm38_vm1, %v199_v40 }
 0x1d0   :  { %1449 = vmatprep.mubr.msk.f32.mxu0 %vm1575_vm0, %v1576_v1  ;;  %1478 = vmatpush3.bf16.msra.mxu0 %v1477_v46  ;;  %v473_v46 = vand.u32 3, %v468_v45  ;;  %vm1360_vm0 = vcmask 130048  }
 0x1d1   :  { %1479 = vmatprep.subr.bf16.mxu0 %v1574_v0  ;;  %v377_v0 = vsub.s32 4, %v1643_v19 }
 0x1d2   :  { %vm1679_vm12 = vcmp.eq.s32.totalorder %v473_v46, 3 }
 0x1d3   :  { %v378_v1 = vrot.slane %v28_v21, %v377_v0 }
 0x1d4   :  { %1481 = vmatpush3.bf16.msra.mxu0 %v1480_v56 }
 0x2a2   :  { %v278_v49 = vpop.f32.mrb[2].mxu0 }
 0x2a3   :  { %v279_v50 = vadd.f32 %v278_v49, %v208_v48  ;;  %v1429_v51 = vpop.f32.mrb[3].mxu0 }
 0x2a5   :  { %vm282_vm4 = vcmp.gt.f32.partialorder %v279_v50, 0.0  ;;  %v283_v52 = vmul.f32 0.01, %v279_v50 }
 0x2a7   :  { %v284_v53 = vsel %vm282_vm4, %v279_v50, %v283_v52 }
 0x2a8   :  { %1439 = vmatmul.mubr.msk.f32.vlgmr.msra.gmra.mrb[2].mxu1 %vm38_vm1, %v284_v53 }
 0x37b   :  { %v363_v59 = vpop.f32.mrb[2].mxu1 }
 0x37c   :  { %v364_v60 = vadd.f32 %v363_v59, %v293_v58  ;;  %v1440_v61 = vpop.f32.mrb[3].mxu1 }
 0x37e   :  { %vm367_vm5 = vcmp.gt.f32.partialorder %v364_v60, 0.0  ;;  %v368_v62 = vmul.f32 0.01, %v364_v60 }
 0x380   :  { %v369_v63 = vsel %vm367_vm5, %v364_v60, %v368_v62 }
 0x381   :  { %1450 = vmatmul.mubr.msk.f32.vlgmr.msra.gmra.mrb[4].mxu0 %vm38_vm1, %v369_v63 }
 0x454   :  { %v448_v2 = vpop.f32.mrb[4].mxu0 }
 0x455   :  { %v449_v3 = vadd.f32 %v448_v2, %v378_v1  ;;  %v1451_v4 = vpop.f32.mrb[5].mxu0 }
 0x457   :  { %v453_v5 = vand.u32 2147483647, %v449_v3  ;;  %v452_v16 = vmax.f32 %v449_v3, 0.0 }
 0x459   :  { %v454_v6 = vsub.f32 0.0, %v453_v5 }
 0x45b   :  { %v455_v7 = vmul.f32 1.442695, %v454_v6 }
 0x45d   :  { %1503 = vpow2.f32 %v455_v7 }
 0x467   :  { %v1504_v8 = vpop.eup %1503 }
 0x468   :  { %v457_v9 = vadd.f32 1.0, %v1504_v8  ;;  %v460_v10 = vmul.f32 -0.5, %v1504_v8  ;;  %v463_v12 = vand.u32 2147483647, %v1504_v8 }
 0x46a   :  { %1505 = vlog2.f32 %v457_v9  ;;  %v461_v11 = vadd.f32 1.0, %v460_v10  ;;  %vm464_vm6 = vcmp.lt.f32.partialorder %v463_v12, 0.0004427343 }
 0x46c   :  { %v462_v15 = vmul.f32 %v1504_v8, %v461_v11 }
 0x474   :  { %v1506_v13 = vpop.eup %1505 }
 0x475   :  { %v459_v14 = vmul.f32 0.6931472, %v1506_v13 }
 0x477   :  { %v465_v17 = vsel %vm464_vm6, %v462_v15, %v459_v14 }
 0x478   :  { %v466_v19 = vadd.f32 %v465_v17, %v452_v16 }
 0x47a   :  { %492 = vrot.lane.b32.xlu1 %v466_v19, %s1577_s2  ;;  %483 = vrot.lane.b32.xlu0 %v466_v19, %s1578_s28 }
 0x47e   :  { %495 = vrot.lane.b32.xlu1 %v466_v19, %s1573_s23  ;;  %486 = vrot.lane.b32.xlu0 %v466_v19, %s1579_s29 }
 0x482   :  { %504 = vrot.lane.b32.xlu1 %v466_v19, %s1580_s30  ;;  %501 = vrot.lane.b32.xlu0 %v466_v19, %s1581_s4 }
 0x4ec   :  { %v493_v20 = vpop.permute.xlu1 %492  ;;  %v484_v21 = vpop.permute.xlu0 %483 }
 0x4f0   :  { %v496_v22 = vpop.permute.xlu1 %495  ;;  %v487_v23 = vpop.permute.xlu0 %486 }
 0x4f1   :  { %v490_v24 = vsel %vm489_vm7, %v484_v21, %v487_v23  ;;  %v499_v26 = vsel %vm498_vm8, %v493_v20, %v496_v22 }
 0x4f2   :  { %v491_v25 = vadd.f32 %v490_v24, %v466_v19 }
 0x4f4   :  { %v505_v27 = vpop.permute.xlu1 %504  ;;  %v500_v28 = vadd.f32 %v499_v26, %v491_v25  ;;  %v502_v29 = vpop.permute.xlu0 %501 }
 0x4f5   :  { %v508_v30 = vsel %vm507_vm9, %v502_v29, %v505_v27 }
 0x4f6   :  { %v509_v31 = vadd.f32 %v508_v30, %v500_v28 }
 0x4f8   :  { %v510_v32 = vmax.f32 %v509_v31, 1e-08 }
 0x4fa   :  { %1507 = vrcp.f32 %v510_v32 }
 0x504   :  { %v1508_v33 = vpop.eup %1507 }
 0x505   :  { %v512_v34 = vmul.f32 %v1508_v33, %v510_v32 }
 0x507   :  { %v513_v35 = vsub.f32 2.0, %v512_v34 }
 0x509   :  { %v514_v36 = vmul.f32 %v1508_v33, %v513_v35 }
 0x50b   :  { %v515_v37 = vmul.f32 %v514_v36, %v510_v32 }
 0x50d   :  { %v516_v38 = vsub.f32 2.0, %v515_v37 }
 0x50f   :  { %v517_v39 = vmul.f32 %v516_v38, %v514_v36 }
 0x511   :  { %v518_v40 = vmul.f32 %v517_v39, %v466_v19 }
 0x513   :  { %523 = vrot.lane.b32.xlu1 %v518_v40, %s1582_s5  ;;  %520 = vrot.lane.b32.xlu0 %v518_v40, %s1583_s6 }
 0x585   :  { %v524_v41 = vpop.permute.xlu1 %523  ;;  %v521_v42 = vpop.permute.xlu0 %520 }
 0x586   :  { %v527_v43 = vsel %vm526_vm10, %v521_v42, %v524_v41 }
 0x587   :  { %v528_v44 = vadd.f32 %v527_v43, %v518_v40 }
 0x589   :  { %533 = vrot.lane.b32.xlu1 %v528_v44, %s1584_s7  ;;  %530 = vrot.lane.b32.xlu0 %v528_v44, %s1585_s8 }
 0x5fb   :  { %v534_v47 = vpop.permute.xlu1 %533  ;;  %v531_v48 = vpop.permute.xlu0 %530 }
 0x5fc   :  { %v537_v50 = vsel %vm536_vm11, %v531_v48, %v534_v47 }
 0x5fd   :  { %v538_v51 = vadd.f32 %v537_v50, %v528_v44 }
 0x5ff   :  { %v539_v52 = vsel %vm1679_vm12, %v538_v51, 0.0 }
 0x600   :  { %544 = vrot.lane.b32.xlu1 %v539_v52, %s1586_s9  ;;  %541 = vrot.lane.b32.xlu0 %v539_v52, %s1587_s10 }
 0x604   :  { %553 = vrot.lane.b32.xlu1 %v539_v52, %s1588_s11  ;;  %550 = vrot.lane.b32.xlu0 %v539_v52, %s1589_s12 }
 0x608   :  { %562 = vrot.lane.b32.xlu1 %v539_v52, %s1590_s13  ;;  %559 = vrot.lane.b32.xlu0 %v539_v52, %s1591_s14 }
 0x672   :  { %v545_v18 = vpop.permute.xlu1 %544  ;;  %v542_v53 = vpop.permute.xlu0 %541 }
 0x673   :  { %v548_v54 = vsel %vm547_vm13, %v542_v53, %v545_v18 }
 0x674   :  { %v549_v58 = vadd.f32 %v548_v54, %v539_v52 }
 0x676   :  { %v554_v55 = vpop.permute.xlu1 %553  ;;  %v551_v56 = vpop.permute.xlu0 %550 }
 0x677   :  { %v557_v57 = vsel %vm556_vm14, %v551_v56, %v554_v55 }
 0x678   :  { %v558_v59 = vadd.f32 %v557_v57, %v549_v58 }
 0x67a   :  { %v563_v60 = vpop.permute.xlu1 %562  ;;  %v560_v61 = vpop.permute.xlu0 %559 }
 0x67b   :  { %v566_v62 = vsel %vm565_vm15, %v560_v61, %v563_v60 }
 0x67c   :  { %v567_v63 = vadd.f32 %v566_v62, %v558_v59 }
 0x67e   :  { %v568_v0 = vmax.f32 %v567_v63, 1e-08 }
 0x680   :  { %1509 = vrcp.f32 %v568_v0 }
 0x68a   :  { %v1510_v1 = vpop.eup %1509 }
 0x68b   :  { %v570_v2 = vmul.f32 %v1510_v1, %v568_v0 }
 0x68d   :  { %v571_v3 = vsub.f32 2.0, %v570_v2 }
 0x68f   :  { %v572_v4 = vmul.f32 %v1510_v1, %v571_v3 }
 0x691   :  { %v573_v5 = vmul.f32 %v572_v4, %v568_v0 }
 0x693   :  { %v574_v6 = vsub.f32 2.0, %v573_v5 }
 0x695   :  { %v575_v7 = vmul.f32 %v574_v6, %v572_v4 }
 0x697   :  { %v576_v8 = vmul.f32 %v575_v7, %v518_v40 }
 0x699   :  { %581 = vrot.lane.b32.xlu1 %v576_v8, %s1579_s29  ;;  %578 = vrot.lane.b32.xlu0 %v576_v8, %s1578_s28 }
 0x69d   :  { %589 = vrot.lane.b32.xlu1 %v576_v8, %s1573_s23  ;;  %586 = vrot.lane.b32.xlu0 %v576_v8, %s1577_s2 }
 0x6a1   :  { %597 = vrot.lane.b32.xlu1 %v576_v8, %s1580_s30  ;;  %594 = vrot.lane.b32.xlu0 %v576_v8, %s1581_s4 }
 0x70b   :  { %v582_v9 = vpop.permute.xlu1 %581  ;;  %v579_v10 = vpop.permute.xlu0 %578 }
 0x70c   :  { %v584_v11 = vsel %vm489_vm7, %v579_v10, %v582_v9 }
 0x70d   :  { %v585_v15 = vadd.f32 %v584_v11, %v576_v8 }
 0x70f   :  { %v590_v12 = vpop.permute.xlu1 %589  ;;  %v587_v13 = vpop.permute.xlu0 %586 }
 0x710   :  { %v592_v14 = vsel %vm498_vm8, %v587_v13, %v590_v12 }
 0x711   :  { %v593_v16 = vadd.f32 %v592_v14, %v585_v15 }
 0x713   :  { %v598_v17 = vpop.permute.xlu1 %597  ;;  %v595_v19 = vpop.permute.xlu0 %594 }
 0x714   :  { %v600_v20 = vsel %vm507_vm9, %v595_v19, %v598_v17 }
 0x715   :  { %v601_v21 = vadd.f32 %v600_v20, %v593_v16 }
 0x717   :  { %v602_v22 = vmax.f32 %v601_v21, 1e-08 }
 0x719   :  { %1511 = vrcp.f32 %v602_v22 }
 0x723   :  { %v1512_v23 = vpop.eup %1511 }
 0x724   :  { %v604_v24 = vmul.f32 %v1512_v23, %v602_v22 }
 0x726   :  { %v605_v25 = vsub.f32 2.0, %v604_v24 }
 0x728   :  { %v606_v26 = vmul.f32 %v1512_v23, %v605_v25 }
 0x72a   :  { %v607_v27 = vmul.f32 %v606_v26, %v602_v22 }
 0x72c   :  { %v608_v28 = vsub.f32 2.0, %v607_v27 }
 0x72e   :  { %v609_v29 = vmul.f32 %v608_v28, %v606_v26 }
 0x730   :  { %v610_v30 = vmul.f32 %v609_v29, %v576_v8 }
 0x732   :  { %615 = vrot.lane.b32.xlu1 %v610_v30, %s1582_s5  ;;  %612 = vrot.lane.b32.xlu0 %v610_v30, %s1583_s6 }
 0x7a4   :  { %v616_v31 = vpop.permute.xlu1 %615  ;;  %v613_v32 = vpop.permute.xlu0 %612 }
 0x7a5   :  { %v618_v33 = vsel %vm526_vm10, %v613_v32, %v616_v31 }
 0x7a6   :  { %v619_v34 = vadd.f32 %v618_v33, %v610_v30 }
 0x7a8   :  { %624 = vrot.lane.b32.xlu1 %v619_v34, %s1584_s7  ;;  %621 = vrot.lane.b32.xlu0 %v619_v34, %s1585_s8 }
 0x81a   :  { %v625_v35 = vpop.permute.xlu1 %624  ;;  %v622_v36 = vpop.permute.xlu0 %621 }
 0x81b   :  { %v627_v37 = vsel %vm536_vm11, %v622_v36, %v625_v35 }
 0x81c   :  { %v628_v38 = vadd.f32 %v627_v37, %v619_v34 }
 0x81e   :  { %v629_v39 = vsel %vm1679_vm12, %v628_v38, 0.0 }
 0x81f   :  { %634 = vrot.lane.b32.xlu1 %v629_v39, %s1586_s9  ;;  %631 = vrot.lane.b32.xlu0 %v629_v39, %s1587_s10 }
 0x823   :  { %642 = vrot.lane.b32.xlu1 %v629_v39, %s1588_s11  ;;  %639 = vrot.lane.b32.xlu0 %v629_v39, %s1589_s12 }
 0x827   :  { %650 = vrot.lane.b32.xlu1 %v629_v39, %s1590_s13  ;;  %647 = vrot.lane.b32.xlu0 %v629_v39, %s1591_s14 }
 0x891   :  { %v635_v40 = vpop.permute.xlu1 %634  ;;  %v632_v41 = vpop.permute.xlu0 %631 }
 0x892   :  { %v637_v42 = vsel %vm547_vm13, %v632_v41, %v635_v40 }
 0x893   :  { %v638_v46 = vadd.f32 %v637_v42, %v629_v39 }
 0x895   :  { %v643_v43 = vpop.permute.xlu1 %642  ;;  %v640_v44 = vpop.permute.xlu0 %639 }
 0x896   :  { %v645_v45 = vsel %vm556_vm14, %v640_v44, %v643_v43 }
 0x897   :  { %v646_v47 = vadd.f32 %v645_v45, %v638_v46 }
 0x899   :  { %v651_v48 = vpop.permute.xlu1 %650  ;;  %v648_v50 = vpop.permute.xlu0 %647 }
 0x89a   :  { %v653_v51 = vsel %vm565_vm15, %v648_v50, %v651_v48 }
 0x89b   :  { %v654_v52 = vadd.f32 %v653_v51, %v646_v47 }
 0x89d   :  { %v655_v18 = vmax.f32 %v654_v52, 1e-08 }
 0x89f   :  { %1513 = vrcp.f32 %v655_v18 }
 0x8a9   :  { %v1514_v53 = vpop.eup %1513 }
 0x8aa   :  { %v657_v54 = vmul.f32 %v1514_v53, %v655_v18 }
 0x8ac   :  { %v658_v55 = vsub.f32 2.0, %v657_v54 }
 0x8ae   :  { %v659_v56 = vmul.f32 %v1514_v53, %v658_v55 }
 0x8b0   :  { %v660_v57 = vmul.f32 %v659_v56, %v655_v18 }
 0x8b2   :  { %v661_v58 = vsub.f32 2.0, %v660_v57 }
 0x8b4   :  { %v662_v59 = vmul.f32 %v661_v58, %v659_v56 }
 0x8b6   :  { %v663_v60 = vmul.f32 %v662_v59, %v610_v30 }
 0x8b8   :  { %668 = vrot.lane.b32.xlu1 %v663_v60, %s1579_s29  ;;  %665 = vrot.lane.b32.xlu0 %v663_v60, %s1578_s28 }
 0x8bc   :  { %676 = vrot.lane.b32.xlu1 %v663_v60, %s1573_s23  ;;  %673 = vrot.lane.b32.xlu0 %v663_v60, %s1577_s2 }
 0x8c0   :  { %684 = vrot.lane.b32.xlu1 %v663_v60, %s1580_s30  ;;  %681 = vrot.lane.b32.xlu0 %v663_v60, %s1581_s4 }
 0x92a   :  { %v669_v61 = vpop.permute.xlu1 %668  ;;  %v666_v62 = vpop.permute.xlu0 %665 }
 0x92b   :  { %v671_v63 = vsel %vm489_vm7, %v666_v62, %v669_v61 }
 0x92c   :  { %v672_v3 = vadd.f32 %v671_v63, %v663_v60 }
 0x92e   :  { %v677_v0 = vpop.permute.xlu1 %676  ;;  %v674_v1 = vpop.permute.xlu0 %673 }
 0x92f   :  { %v679_v2 = vsel %vm498_vm8, %v674_v1, %v677_v0 }
 0x930   :  { %v680_v4 = vadd.f32 %v679_v2, %v672_v3 }
 0x932   :  { %v685_v5 = vpop.permute.xlu1 %684  ;;  %v682_v6 = vpop.permute.xlu0 %681 }
 0x933   :  { %v687_v7 = vsel %vm507_vm9, %v682_v6, %v685_v5 }
 0x934   :  { %v688_v8 = vadd.f32 %v687_v7, %v680_v4 }
 0x936   :  { %v689_v9 = vmax.f32 %v688_v8, 1e-08 }
 0x938   :  { %1515 = vrcp.f32 %v689_v9 }
 0x942   :  { %v1516_v10 = vpop.eup %1515 }
 0x943   :  { %v691_v11 = vmul.f32 %v1516_v10, %v689_v9 }
 0x945   :  { %v692_v12 = vsub.f32 2.0, %v691_v11 }
 0x947   :  { %v693_v13 = vmul.f32 %v1516_v10, %v692_v12 }
 0x949   :  { %v694_v14 = vmul.f32 %v693_v13, %v689_v9 }
 0x94b   :  { %v695_v15 = vsub.f32 2.0, %v694_v14 }
 0x94d   :  { %v696_v16 = vmul.f32 %v695_v15, %v693_v13 }
 0x94f   :  { %v697_v17 = vmul.f32 %v696_v16, %v663_v60 }
 0x951   :  { %702 = vrot.lane.b32.xlu1 %v697_v17, %s1582_s5  ;;  %699 = vrot.lane.b32.xlu0 %v697_v17, %s1583_s6 }
 0x9c3   :  { %v703_v19 = vpop.permute.xlu1 %702  ;;  %v700_v20 = vpop.permute.xlu0 %699 }
 0x9c4   :  { %v705_v21 = vsel %vm526_vm10, %v700_v20, %v703_v19 }
 0x9c5   :  { %v706_v22 = vadd.f32 %v705_v21, %v697_v17 }
 0x9c7   :  { %711 = vrot.lane.b32.xlu1 %v706_v22, %s1584_s7  ;;  %708 = vrot.lane.b32.xlu0 %v706_v22, %s1585_s8 }
 0xa39   :  { %v712_v23 = vpop.permute.xlu1 %711  ;;  %v709_v24 = vpop.permute.xlu0 %708 }
 0xa3a   :  { %v714_v25 = vsel %vm536_vm11, %v709_v24, %v712_v23 }
 0xa3b   :  { %v715_v26 = vadd.f32 %v714_v25, %v706_v22 }
 0xa3d   :  { %v716_v27 = vsel %vm1679_vm12, %v715_v26, 0.0 }
 0xa3e   :  { %721 = vrot.lane.b32.xlu1 %v716_v27, %s1586_s9  ;;  %718 = vrot.lane.b32.xlu0 %v716_v27, %s1587_s10 }
 0xa42   :  { %729 = vrot.lane.b32.xlu1 %v716_v27, %s1588_s11  ;;  %726 = vrot.lane.b32.xlu0 %v716_v27, %s1589_s12 }
 0xa46   :  { %737 = vrot.lane.b32.xlu1 %v716_v27, %s1590_s13  ;;  %734 = vrot.lane.b32.xlu0 %v716_v27, %s1591_s14 }
 0xab0   :  { %v722_v28 = vpop.permute.xlu1 %721  ;;  %v719_v29 = vpop.permute.xlu0 %718 }
 0xab1   :  { %v724_v30 = vsel %vm547_vm13, %v719_v29, %v722_v28 }
 0xab2   :  { %v725_v34 = vadd.f32 %v724_v30, %v716_v27 }
 0xab4   :  { %v730_v31 = vpop.permute.xlu1 %729  ;;  %v727_v32 = vpop.permute.xlu0 %726 }
 0xab5   :  { %v732_v33 = vsel %vm556_vm14, %v727_v32, %v730_v31 }
 0xab6   :  { %v733_v35 = vadd.f32 %v732_v33, %v725_v34 }
 0xab8   :  { %v738_v36 = vpop.permute.xlu1 %737  ;;  %v735_v37 = vpop.permute.xlu0 %734 }
 0xab9   :  { %v740_v38 = vsel %vm565_vm15, %v735_v37, %v738_v36 }
 0xaba   :  { %v741_v39 = vadd.f32 %v740_v38, %v733_v35 }
 0xabc   :  { %v742_v40 = vmax.f32 %v741_v39, 1e-08 }
 0xabe   :  { %1517 = vrcp.f32 %v742_v40 }
 0xac8   :  { %v1518_v41 = vpop.eup %1517 }
 0xac9   :  { %v744_v42 = vmul.f32 %v1518_v41, %v742_v40 }
 0xacb   :  { %v745_v43 = vsub.f32 2.0, %v744_v42 }
 0xacd   :  { %v746_v44 = vmul.f32 %v1518_v41, %v745_v43 }
 0xacf   :  { %v747_v45 = vmul.f32 %v746_v44, %v742_v40 }
 0xad1   :  { %v748_v46 = vsub.f32 2.0, %v747_v45 }
 0xad3   :  { %v749_v47 = vmul.f32 %v748_v46, %v746_v44 }
 0xad5   :  { %v750_v48 = vmul.f32 %v749_v47, %v697_v17 }
 0xad7   :  { %755 = vrot.lane.b32.xlu1 %v750_v48, %s1579_s29  ;;  %752 = vrot.lane.b32.xlu0 %v750_v48, %s1578_s28 }
 0xadb   :  { %763 = vrot.lane.b32.xlu1 %v750_v48, %s1573_s23  ;;  %760 = vrot.lane.b32.xlu0 %v750_v48, %s1577_s2 }
 0xadf   :  { %771 = vrot.lane.b32.xlu1 %v750_v48, %s1580_s30  ;;  %768 = vrot.lane.b32.xlu0 %v750_v48, %s1581_s4 }
 0xb49   :  { %v756_v50 = vpop.permute.xlu1 %755  ;;  %v753_v51 = vpop.permute.xlu0 %752 }
 0xb4a   :  { %v758_v52 = vsel %vm489_vm7, %v753_v51, %v756_v50 }
 0xb4b   :  { %v759_v55 = vadd.f32 %v758_v52, %v750_v48 }
 0xb4d   :  { %v764_v18 = vpop.permute.xlu1 %763  ;;  %v761_v53 = vpop.permute.xlu0 %760 }
 0xb4e   :  { %v766_v54 = vsel %vm498_vm8, %v761_v53, %v764_v18 }
 0xb4f   :  { %v767_v56 = vadd.f32 %v766_v54, %v759_v55 }
 0xb51   :  { %v772_v57 = vpop.permute.xlu1 %771  ;;  %v769_v58 = vpop.permute.xlu0 %768 }
 0xb52   :  { %v774_v59 = vsel %vm507_vm9, %v769_v58, %v772_v57 }
 0xb53   :  { %v775_v60 = vadd.f32 %v774_v59, %v767_v56 }
 0xb55   :  { %v776_v61 = vmax.f32 %v775_v60, 1e-08 }
 0xb57   :  { %1519 = vrcp.f32 %v776_v61 }
 0xb61   :  { %v1520_v62 = vpop.eup %1519 }
 0xb62   :  { %v778_v63 = vmul.f32 %v1520_v62, %v776_v61 }
 0xb64   :  { %v779_v0 = vsub.f32 2.0, %v778_v63 }
 0xb66   :  { %v780_v1 = vmul.f32 %v1520_v62, %v779_v0 }
 0xb68   :  { %v781_v2 = vmul.f32 %v780_v1, %v776_v61 }
 0xb6a   :  { %v782_v3 = vsub.f32 2.0, %v781_v2 }
 0xb6c   :  { %v783_v4 = vmul.f32 %v782_v3, %v780_v1 }
 0xb6e   :  { %v784_v5 = vmul.f32 %v783_v4, %v750_v48 }
 0xb70   :  { %789 = vrot.lane.b32.xlu1 %v784_v5, %s1582_s5  ;;  %786 = vrot.lane.b32.xlu0 %v784_v5, %s1583_s6 }
 0xbe2   :  { %v790_v6 = vpop.permute.xlu1 %789  ;;  %v787_v7 = vpop.permute.xlu0 %786 }
 0xbe3   :  { %v792_v8 = vsel %vm526_vm10, %v787_v7, %v790_v6 }
 0xbe4   :  { %v793_v9 = vadd.f32 %v792_v8, %v784_v5 }
 0xbe6   :  { %798 = vrot.lane.b32.xlu1 %v793_v9, %s1584_s7  ;;  %795 = vrot.lane.b32.xlu0 %v793_v9, %s1585_s8 }
 0xc58   :  { %v799_v10 = vpop.permute.xlu1 %798  ;;  %v796_v11 = vpop.permute.xlu0 %795 }
 0xc59   :  { %v801_v12 = vsel %vm536_vm11, %v796_v11, %v799_v10 }
 0xc5a   :  { %v802_v13 = vadd.f32 %v801_v12, %v793_v9 }
 0xc5c   :  { %v803_v14 = vsel %vm1679_vm12, %v802_v13, 0.0 }
 0xc5d   :  { %808 = vrot.lane.b32.xlu1 %v803_v14, %s1586_s9  ;;  %805 = vrot.lane.b32.xlu0 %v803_v14, %s1587_s10 }
 0xc61   :  { %816 = vrot.lane.b32.xlu1 %v803_v14, %s1588_s11  ;;  %813 = vrot.lane.b32.xlu0 %v803_v14, %s1589_s12 }
 0xc65   :  { %824 = vrot.lane.b32.xlu1 %v803_v14, %s1590_s13  ;;  %821 = vrot.lane.b32.xlu0 %v803_v14, %s1591_s14 }
 0xccf   :  { %v809_v15 = vpop.permute.xlu1 %808  ;;  %v806_v16 = vpop.permute.xlu0 %805 }
 0xcd0   :  { %v811_v17 = vsel %vm547_vm13, %v806_v16, %v809_v15 }
 0xcd1   :  { %v812_v22 = vadd.f32 %v811_v17, %v803_v14 }
 0xcd3   :  { %v817_v19 = vpop.permute.xlu1 %816  ;;  %v814_v20 = vpop.permute.xlu0 %813 }
 0xcd4   :  { %v819_v21 = vsel %vm556_vm14, %v814_v20, %v817_v19 }
 0xcd5   :  { %v820_v23 = vadd.f32 %v819_v21, %v812_v22 }
 0xcd7   :  { %v825_v24 = vpop.permute.xlu1 %824  ;;  %v822_v25 = vpop.permute.xlu0 %821 }
 0xcd8   :  { %v827_v26 = vsel %vm565_vm15, %v822_v25, %v825_v24 }
 0xcd9   :  { %v828_v27 = vadd.f32 %v827_v26, %v820_v23 }
 0xcdb   :  { %v829_v28 = vmax.f32 %v828_v27, 1e-08 }
 0xcdd   :  { %1521 = vrcp.f32 %v829_v28 }
 0xce7   :  { %v1522_v29 = vpop.eup %1521 }
 0xce8   :  { %v831_v30 = vmul.f32 %v1522_v29, %v829_v28 }
 0xcea   :  { %v832_v31 = vsub.f32 2.0, %v831_v30 }
 0xcec   :  { %v833_v32 = vmul.f32 %v1522_v29, %v832_v31 }
 0xcee   :  { %v834_v33 = vmul.f32 %v833_v32, %v829_v28 }
 0xcf0   :  { %v835_v34 = vsub.f32 2.0, %v834_v33 }
 0xcf2   :  { %v836_v35 = vmul.f32 %v835_v34, %v833_v32 }
 0xcf4   :  { %v837_v36 = vmul.f32 %v836_v35, %v784_v5 }
 0xcf6   :  { %842 = vrot.lane.b32.xlu1 %v837_v36, %s1579_s29  ;;  %839 = vrot.lane.b32.xlu0 %v837_v36, %s1578_s28 }
 0xcfa   :  { %850 = vrot.lane.b32.xlu1 %v837_v36, %s1573_s23  ;;  %847 = vrot.lane.b32.xlu0 %v837_v36, %s1577_s2 }
 0xcfe   :  { %858 = vrot.lane.b32.xlu1 %v837_v36, %s1580_s30  ;;  %855 = vrot.lane.b32.xlu0 %v837_v36, %s1581_s4 }
 0xd68   :  { %v843_v37 = vpop.permute.xlu1 %842  ;;  %v840_v38 = vpop.permute.xlu0 %839 }
 0xd69   :  { %v845_v39 = vsel %vm489_vm7, %v840_v38, %v843_v37 }
 0xd6a   :  { %v846_v43 = vadd.f32 %v845_v39, %v837_v36 }
 0xd6c   :  { %v851_v40 = vpop.permute.xlu1 %850  ;;  %v848_v41 = vpop.permute.xlu0 %847 }
 0xd6d   :  { %v853_v42 = vsel %vm498_vm8, %v848_v41, %v851_v40 }
 0xd6e   :  { %v854_v44 = vadd.f32 %v853_v42, %v846_v43 }
 0xd70   :  { %v859_v45 = vpop.permute.xlu1 %858  ;;  %v856_v46 = vpop.permute.xlu0 %855 }
 0xd71   :  { %v861_v47 = vsel %vm507_vm9, %v856_v46, %v859_v45 }
 0xd72   :  { %v862_v48 = vadd.f32 %v861_v47, %v854_v44 }
 0xd74   :  { %v863_v50 = vmax.f32 %v862_v48, 1e-08 }
 0xd76   :  { %1523 = vrcp.f32 %v863_v50 }
 0xd80   :  { %v1524_v51 = vpop.eup %1523 }
 0xd81   :  { %v865_v52 = vmul.f32 %v1524_v51, %v863_v50 }
 0xd83   :  { %v866_v18 = vsub.f32 2.0, %v865_v52 }
 0xd85   :  { %v867_v53 = vmul.f32 %v1524_v51, %v866_v18 }
 0xd87   :  { %v868_v54 = vmul.f32 %v867_v53, %v863_v50 }
 0xd89   :  { %v869_v55 = vsub.f32 2.0, %v868_v54 }
 0xd8b   :  { %v870_v56 = vmul.f32 %v869_v55, %v867_v53 }
 0xd8d   :  { %v871_v57 = vmul.f32 %v870_v56, %v837_v36 }
 0xd8f   :  { %876 = vrot.lane.b32.xlu1 %v871_v57, %s1582_s5  ;;  %873 = vrot.lane.b32.xlu0 %v871_v57, %s1583_s6 }
 0xe01   :  { %v877_v58 = vpop.permute.xlu1 %876  ;;  %v874_v59 = vpop.permute.xlu0 %873 }
 0xe02   :  { %v879_v60 = vsel %vm526_vm10, %v874_v59, %v877_v58 }
 0xe03   :  { %v880_v61 = vadd.f32 %v879_v60, %v871_v57 }
 0xe05   :  { %885 = vrot.lane.b32.xlu1 %v880_v61, %s1584_s7  ;;  %882 = vrot.lane.b32.xlu0 %v880_v61, %s1585_s8 }
 0xe77   :  { %v886_v62 = vpop.permute.xlu1 %885  ;;  %v883_v63 = vpop.permute.xlu0 %882 }
 0xe78   :  { %v888_v0 = vsel %vm536_vm11, %v883_v63, %v886_v62 }
 0xe79   :  { %v889_v1 = vadd.f32 %v888_v0, %v880_v61 }
 0xe7b   :  { %v890_v2 = vsel %vm1679_vm12, %v889_v1, 0.0 }
 0xe7c   :  { %895 = vrot.lane.b32.xlu1 %v890_v2, %s1586_s9  ;;  %892 = vrot.lane.b32.xlu0 %v890_v2, %s1587_s10 }
 0xe80   :  { %903 = vrot.lane.b32.xlu1 %v890_v2, %s1588_s11  ;;  %900 = vrot.lane.b32.xlu0 %v890_v2, %s1589_s12 }
 0xe84   :  { %911 = vrot.lane.b32.xlu1 %v890_v2, %s1590_s13  ;;  %908 = vrot.lane.b32.xlu0 %v890_v2, %s1591_s14 }
 0xeee   :  { %v896_v3 = vpop.permute.xlu1 %895  ;;  %v893_v4 = vpop.permute.xlu0 %892 }
 0xeef   :  { %v898_v5 = vsel %vm547_vm13, %v893_v4, %v896_v3 }
 0xef0   :  { %v899_v9 = vadd.f32 %v898_v5, %v890_v2 }
 0xef2   :  { %v904_v6 = vpop.permute.xlu1 %903  ;;  %v901_v7 = vpop.permute.xlu0 %900 }
 0xef3   :  { %v906_v8 = vsel %vm556_vm14, %v901_v7, %v904_v6 }
 0xef4   :  { %v907_v10 = vadd.f32 %v906_v8, %v899_v9 }
 0xef6   :  { %v912_v11 = vpop.permute.xlu1 %911  ;;  %v909_v12 = vpop.permute.xlu0 %908 }
 0xef7   :  { %v914_v13 = vsel %vm565_vm15, %v909_v12, %v912_v11 }
 0xef8   :  { %v915_v14 = vadd.f32 %v914_v13, %v907_v10 }
 0xefa   :  { %v916_v15 = vmax.f32 %v915_v14, 1e-08 }
 0xefc   :  { %1525 = vrcp.f32 %v916_v15 }
 0xf06   :  { %v1526_v16 = vpop.eup %1525 }
 0xf07   :  { %v918_v17 = vmul.f32 %v1526_v16, %v916_v15 }
 0xf09   :  { %v919_v19 = vsub.f32 2.0, %v918_v17 }
 0xf0b   :  { %v920_v20 = vmul.f32 %v1526_v16, %v919_v19 }
 0xf0d   :  { %v921_v21 = vmul.f32 %v920_v20, %v916_v15 }
 0xf0f   :  { %v922_v22 = vsub.f32 2.0, %v921_v21 }
 0xf11   :  { %v923_v23 = vmul.f32 %v922_v22, %v920_v20 }
 0xf13   :  { %v924_v24 = vmul.f32 %v923_v23, %v871_v57 }
 0xf15   :  { %929 = vrot.lane.b32.xlu1 %v924_v24, %s1579_s29  ;;  %926 = vrot.lane.b32.xlu0 %v924_v24, %s1578_s28 }
 0xf19   :  { %937 = vrot.lane.b32.xlu1 %v924_v24, %s1573_s23  ;;  %934 = vrot.lane.b32.xlu0 %v924_v24, %s1577_s2 }
 0xf1d   :  { %945 = vrot.lane.b32.xlu1 %v924_v24, %s1580_s30  ;;  %942 = vrot.lane.b32.xlu0 %v924_v24, %s1581_s4 }
 0xf87   :  { %v930_v25 = vpop.permute.xlu1 %929  ;;  %v927_v26 = vpop.permute.xlu0 %926 }
 0xf88   :  { %v932_v27 = vsel %vm489_vm7, %v927_v26, %v930_v25 }
 0xf89   :  { %v933_v31 = vadd.f32 %v932_v27, %v924_v24 }
 0xf8b   :  { %v938_v28 = vpop.permute.xlu1 %937  ;;  %v935_v29 = vpop.permute.xlu0 %934 }
 0xf8c   :  { %v940_v30 = vsel %vm498_vm8, %v935_v29, %v938_v28 }
 0xf8d   :  { %v941_v32 = vadd.f32 %v940_v30, %v933_v31 }
 0xf8f   :  { %v946_v33 = vpop.permute.xlu1 %945  ;;  %v943_v34 = vpop.permute.xlu0 %942 }
 0xf90   :  { %v948_v35 = vsel %vm507_vm9, %v943_v34, %v946_v33 }
 0xf91   :  { %v949_v36 = vadd.f32 %v948_v35, %v941_v32 }
 0xf93   :  { %v950_v37 = vmax.f32 %v949_v36, 1e-08 }
 0xf95   :  { %1527 = vrcp.f32 %v950_v37 }
 0xf9f   :  { %v1528_v38 = vpop.eup %1527 }
 0xfa0   :  { %v952_v39 = vmul.f32 %v1528_v38, %v950_v37 }
 0xfa2   :  { %v953_v40 = vsub.f32 2.0, %v952_v39 }
 0xfa4   :  { %v954_v41 = vmul.f32 %v1528_v38, %v953_v40 }
 0xfa6   :  { %v955_v42 = vmul.f32 %v954_v41, %v950_v37 }
 0xfa8   :  { %v956_v43 = vsub.f32 2.0, %v955_v42 }
 0xfaa   :  { %v957_v44 = vmul.f32 %v956_v43, %v954_v41 }
 0xfac   :  { %v958_v45 = vmul.f32 %v957_v44, %v924_v24 }
 0xfae   :  { %963 = vrot.lane.b32.xlu1 %v958_v45, %s1582_s5  ;;  %960 = vrot.lane.b32.xlu0 %v958_v45, %s1583_s6 }
0x1020   :  { %v964_v46 = vpop.permute.xlu1 %963  ;;  %v961_v47 = vpop.permute.xlu0 %960 }
0x1021   :  { %v966_v48 = vsel %vm526_vm10, %v961_v47, %v964_v46 }
0x1022   :  { %v967_v50 = vadd.f32 %v966_v48, %v958_v45 }
0x1024   :  { %972 = vrot.lane.b32.xlu1 %v967_v50, %s1584_s7  ;;  %969 = vrot.lane.b32.xlu0 %v967_v50, %s1585_s8 }
0x1096   :  { %v973_v51 = vpop.permute.xlu1 %972  ;;  %v970_v52 = vpop.permute.xlu0 %969 }
0x1097   :  { %v975_v18 = vsel %vm536_vm11, %v970_v52, %v973_v51 }
0x1098   :  { %v976_v53 = vadd.f32 %v975_v18, %v967_v50 }
0x109a   :  { %v977_v54 = vsel %vm1679_vm12, %v976_v53, 0.0 }
0x109b   :  { %982 = vrot.lane.b32.xlu1 %v977_v54, %s1586_s9  ;;  %979 = vrot.lane.b32.xlu0 %v977_v54, %s1587_s10 }
0x109f   :  { %990 = vrot.lane.b32.xlu1 %v977_v54, %s1588_s11  ;;  %987 = vrot.lane.b32.xlu0 %v977_v54, %s1589_s12 }
0x10a3   :  { %998 = vrot.lane.b32.xlu1 %v977_v54, %s1590_s13  ;;  %995 = vrot.lane.b32.xlu0 %v977_v54, %s1591_s14 }
0x110d   :  { %v983_v55 = vpop.permute.xlu1 %982  ;;  %v980_v56 = vpop.permute.xlu0 %979 }
0x110e   :  { %v985_v57 = vsel %vm547_vm13, %v980_v56, %v983_v55 }
0x110f   :  { %v986_v61 = vadd.f32 %v985_v57, %v977_v54 }
0x1111   :  { %v991_v58 = vpop.permute.xlu1 %990  ;;  %v988_v59 = vpop.permute.xlu0 %987 }
0x1112   :  { %v993_v60 = vsel %vm556_vm14, %v988_v59, %v991_v58 }
0x1113   :  { %v994_v62 = vadd.f32 %v993_v60, %v986_v61 }
0x1115   :  { %v999_v63 = vpop.permute.xlu1 %998  ;;  %v996_v0 = vpop.permute.xlu0 %995 }
0x1116   :  { %v1001_v1 = vsel %vm565_vm15, %v996_v0, %v999_v63 }
0x1117   :  { %v1002_v2 = vadd.f32 %v1001_v1, %v994_v62 }
0x1119   :  { %v1003_v3 = vmax.f32 %v1002_v2, 1e-08 }
0x111b   :  { %1529 = vrcp.f32 %v1003_v3 }
0x1125   :  { %v1530_v4 = vpop.eup %1529 }
0x1126   :  { %v1005_v5 = vmul.f32 %v1530_v4, %v1003_v3 }
0x1128   :  { %v1006_v6 = vsub.f32 2.0, %v1005_v5 }
0x112a   :  { %v1007_v7 = vmul.f32 %v1530_v4, %v1006_v6 }
0x112c   :  { %v1008_v8 = vmul.f32 %v1007_v7, %v1003_v3 }
0x112e   :  { %v1009_v9 = vsub.f32 2.0, %v1008_v8 }
0x1130   :  { %v1010_v10 = vmul.f32 %v1009_v9, %v1007_v7 }
0x1132   :  { %v1011_v11 = vmul.f32 %v1010_v10, %v958_v45 }
0x1134   :  { %1016 = vrot.lane.b32.xlu1 %v1011_v11, %s1579_s29  ;;  %1013 = vrot.lane.b32.xlu0 %v1011_v11, %s1578_s28 }
0x1138   :  { %1024 = vrot.lane.b32.xlu1 %v1011_v11, %s1573_s23  ;;  %1021 = vrot.lane.b32.xlu0 %v1011_v11, %s1577_s2 }
0x113c   :  { %1032 = vrot.lane.b32.xlu1 %v1011_v11, %s1580_s30  ;;  %1029 = vrot.lane.b32.xlu0 %v1011_v11, %s1581_s4 }
0x11a6   :  { %v1017_v12 = vpop.permute.xlu1 %1016  ;;  %v1014_v13 = vpop.permute.xlu0 %1013 }
0x11a7   :  { %v1019_v14 = vsel %vm489_vm7, %v1014_v13, %v1017_v12 }
0x11a8   :  { %v1020_v19 = vadd.f32 %v1019_v14, %v1011_v11 }
0x11aa   :  { %v1025_v15 = vpop.permute.xlu1 %1024  ;;  %v1022_v16 = vpop.permute.xlu0 %1021 }
0x11ab   :  { %v1027_v17 = vsel %vm498_vm8, %v1022_v16, %v1025_v15 }
0x11ac   :  { %v1028_v20 = vadd.f32 %v1027_v17, %v1020_v19 }
0x11ae   :  { %v1033_v21 = vpop.permute.xlu1 %1032  ;;  %v1030_v22 = vpop.permute.xlu0 %1029 }
0x11af   :  { %v1035_v23 = vsel %vm507_vm9, %v1030_v22, %v1033_v21 }
0x11b0   :  { %v1036_v24 = vadd.f32 %v1035_v23, %v1028_v20 }
0x11b2   :  { %v1037_v25 = vmax.f32 %v1036_v24, 1e-08 }
0x11b4   :  { %1531 = vrcp.f32 %v1037_v25 }
0x11be   :  { %v1532_v26 = vpop.eup %1531 }
0x11bf   :  { %v1039_v27 = vmul.f32 %v1532_v26, %v1037_v25 }
0x11c1   :  { %v1040_v28 = vsub.f32 2.0, %v1039_v27 }
0x11c3   :  { %v1041_v29 = vmul.f32 %v1532_v26, %v1040_v28 }
0x11c5   :  { %v1042_v30 = vmul.f32 %v1041_v29, %v1037_v25 }
0x11c7   :  { %v1043_v31 = vsub.f32 2.0, %v1042_v30 }
0x11c9   :  { %v1044_v32 = vmul.f32 %v1043_v31, %v1041_v29 }
0x11cb   :  { %v1045_v33 = vmul.f32 %v1044_v32, %v1011_v11 }
0x11cd   :  { %1050 = vrot.lane.b32.xlu1 %v1045_v33, %s1582_s5  ;;  %1047 = vrot.lane.b32.xlu0 %v1045_v33, %s1583_s6 }
0x123f   :  { %v1051_v34 = vpop.permute.xlu1 %1050  ;;  %v1048_v35 = vpop.permute.xlu0 %1047 }
0x1240   :  { %v1053_v36 = vsel %vm526_vm10, %v1048_v35, %v1051_v34 }
0x1241   :  { %v1054_v37 = vadd.f32 %v1053_v36, %v1045_v33 }
0x1243   :  { %1059 = vrot.lane.b32.xlu1 %v1054_v37, %s1584_s7  ;;  %1056 = vrot.lane.b32.xlu0 %v1054_v37, %s1585_s8 }
0x12b5   :  { %v1060_v38 = vpop.permute.xlu1 %1059  ;;  %v1057_v39 = vpop.permute.xlu0 %1056 }
0x12b6   :  { %v1062_v40 = vsel %vm536_vm11, %v1057_v39, %v1060_v38 }
0x12b7   :  { %v1063_v41 = vadd.f32 %v1062_v40, %v1054_v37 }
0x12b9   :  { %v1064_v42 = vsel %vm1679_vm12, %v1063_v41, 0.0 }
0x12ba   :  { %1069 = vrot.lane.b32.xlu1 %v1064_v42, %s1586_s9  ;;  %1066 = vrot.lane.b32.xlu0 %v1064_v42, %s1587_s10 }
0x12be   :  { %1077 = vrot.lane.b32.xlu1 %v1064_v42, %s1588_s11  ;;  %1074 = vrot.lane.b32.xlu0 %v1064_v42, %s1589_s12 }
0x12c2   :  { %1085 = vrot.lane.b32.xlu1 %v1064_v42, %s1590_s13  ;;  %1082 = vrot.lane.b32.xlu0 %v1064_v42, %s1591_s14 }
0x132c   :  { %v1070_v43 = vpop.permute.xlu1 %1069  ;;  %v1067_v44 = vpop.permute.xlu0 %1066 }
0x132d   :  { %v1072_v45 = vsel %vm547_vm13, %v1067_v44, %v1070_v43 }
0x132e   :  { %v1073_v50 = vadd.f32 %v1072_v45, %v1064_v42 }
0x1330   :  { %v1078_v46 = vpop.permute.xlu1 %1077  ;;  %v1075_v47 = vpop.permute.xlu0 %1074 }
0x1331   :  { %v1080_v48 = vsel %vm556_vm14, %v1075_v47, %v1078_v46 }
0x1332   :  { %v1081_v51 = vadd.f32 %v1080_v48, %v1073_v50 }
0x1334   :  { %v1086_v52 = vpop.permute.xlu1 %1085  ;;  %v1083_v18 = vpop.permute.xlu0 %1082 }
0x1335   :  { %v1088_v53 = vsel %vm565_vm15, %v1083_v18, %v1086_v52 }
0x1336   :  { %v1089_v54 = vadd.f32 %v1088_v53, %v1081_v51 }
0x1338   :  { %v1090_v55 = vmax.f32 %v1089_v54, 1e-08 }
0x133a   :  { %1533 = vrcp.f32 %v1090_v55 }
0x1344   :  { %v1534_v56 = vpop.eup %1533 }
0x1345   :  { %v1092_v57 = vmul.f32 %v1534_v56, %v1090_v55 }
0x1347   :  { %v1093_v58 = vsub.f32 2.0, %v1092_v57 }
0x1349   :  { %v1094_v59 = vmul.f32 %v1534_v56, %v1093_v58 }
0x134b   :  { %v1095_v60 = vmul.f32 %v1094_v59, %v1090_v55 }
0x134d   :  { %v1096_v61 = vsub.f32 2.0, %v1095_v60 }
0x134f   :  { %v1097_v62 = vmul.f32 %v1096_v61, %v1094_v59 }
0x1351   :  { %v1098_v63 = vmul.f32 %v1097_v62, %v1045_v33 }
0x1353   :  { %1103 = vrot.lane.b32.xlu1 %v1098_v63, %s1579_s29  ;;  %1100 = vrot.lane.b32.xlu0 %v1098_v63, %s1578_s28 }
0x1357   :  { %1111 = vrot.lane.b32.xlu1 %v1098_v63, %s1573_s23  ;;  %1108 = vrot.lane.b32.xlu0 %v1098_v63, %s1577_s2 }
0x135b   :  { %1119 = vrot.lane.b32.xlu1 %v1098_v63, %s1580_s30  ;;  %1116 = vrot.lane.b32.xlu0 %v1098_v63, %s1581_s4 }
0x13c5   :  { %v1104_v0 = vpop.permute.xlu1 %1103  ;;  %v1101_v1 = vpop.permute.xlu0 %1100 }
0x13c6   :  { %v1106_v2 = vsel %vm489_vm7, %v1101_v1, %v1104_v0 }
0x13c7   :  { %v1107_v6 = vadd.f32 %v1106_v2, %v1098_v63 }
0x13c9   :  { %v1112_v3 = vpop.permute.xlu1 %1111  ;;  %v1109_v4 = vpop.permute.xlu0 %1108 }
0x13ca   :  { %v1114_v5 = vsel %vm498_vm8, %v1109_v4, %v1112_v3 }
0x13cb   :  { %v1115_v7 = vadd.f32 %v1114_v5, %v1107_v6 }
0x13cd   :  { %v1120_v8 = vpop.permute.xlu1 %1119  ;;  %v1117_v9 = vpop.permute.xlu0 %1116 }
0x13ce   :  { %v1122_v10 = vsel %vm507_vm9, %v1117_v9, %v1120_v8 }
0x13cf   :  { %v1123_v11 = vadd.f32 %v1122_v10, %v1115_v7 }
0x13d1   :  { %v1124_v12 = vmax.f32 %v1123_v11, 1e-08 }
0x13d3   :  { %1535 = vrcp.f32 %v1124_v12 }
0x13dd   :  { %v1536_v13 = vpop.eup %1535 }
0x13de   :  { %v1126_v14 = vmul.f32 %v1536_v13, %v1124_v12 }
0x13e0   :  { %v1127_v15 = vsub.f32 2.0, %v1126_v14 }
0x13e2   :  { %v1128_v16 = vmul.f32 %v1536_v13, %v1127_v15 }
0x13e4   :  { %v1129_v17 = vmul.f32 %v1128_v16, %v1124_v12 }
0x13e6   :  { %v1130_v19 = vsub.f32 2.0, %v1129_v17 }
0x13e8   :  { %v1131_v20 = vmul.f32 %v1130_v19, %v1128_v16 }
0x13ea   :  { %v1132_v21 = vmul.f32 %v1131_v20, %v1098_v63 }
0x13ec   :  { %1137 = vrot.lane.b32.xlu1 %v1132_v21, %s1582_s5  ;;  %1134 = vrot.lane.b32.xlu0 %v1132_v21, %s1583_s6 }
0x145e   :  { %v1138_v22 = vpop.permute.xlu1 %1137  ;;  %v1135_v23 = vpop.permute.xlu0 %1134 }
0x145f   :  { %v1140_v24 = vsel %vm526_vm10, %v1135_v23, %v1138_v22 }
0x1460   :  { %v1141_v25 = vadd.f32 %v1140_v24, %v1132_v21 }
0x1462   :  { %1146 = vrot.lane.b32.xlu1 %v1141_v25, %s1584_s7  ;;  %1143 = vrot.lane.b32.xlu0 %v1141_v25, %s1585_s8 }
0x14d4   :  { %v1147_v26 = vpop.permute.xlu1 %1146  ;;  %v1144_v27 = vpop.permute.xlu0 %1143 }
0x14d5   :  { %v1149_v28 = vsel %vm536_vm11, %v1144_v27, %v1147_v26 }
0x14d6   :  { %v1150_v29 = vadd.f32 %v1149_v28, %v1141_v25 }
0x14d8   :  { %v1151_v30 = vsel %vm1679_vm12, %v1150_v29, 0.0 }
0x14d9   :  { %1156 = vrot.lane.b32.xlu1 %v1151_v30, %s1586_s9  ;;  %1153 = vrot.lane.b32.xlu0 %v1151_v30, %s1587_s10 }
0x14dd   :  { %1164 = vrot.lane.b32.xlu1 %v1151_v30, %s1588_s11  ;;  %1161 = vrot.lane.b32.xlu0 %v1151_v30, %s1589_s12 }
0x14e1   :  { %1172 = vrot.lane.b32.xlu1 %v1151_v30, %s1590_s13  ;;  %1169 = vrot.lane.b32.xlu0 %v1151_v30, %s1591_s14 }
0x154b   :  { %v1157_v31 = vpop.permute.xlu1 %1156  ;;  %v1154_v32 = vpop.permute.xlu0 %1153 }
0x154c   :  { %v1159_v33 = vsel %vm547_vm13, %v1154_v32, %v1157_v31 }
0x154d   :  { %v1160_v37 = vadd.f32 %v1159_v33, %v1151_v30 }
0x154f   :  { %v1165_v34 = vpop.permute.xlu1 %1164  ;;  %v1162_v35 = vpop.permute.xlu0 %1161 }
0x1550   :  { %v1167_v36 = vsel %vm556_vm14, %v1162_v35, %v1165_v34 }
0x1551   :  { %v1168_v38 = vadd.f32 %v1167_v36, %v1160_v37 }
0x1553   :  { %v1173_v39 = vpop.permute.xlu1 %1172  ;;  %v1170_v40 = vpop.permute.xlu0 %1169 }
0x1554   :  { %v1175_v41 = vsel %vm565_vm15, %v1170_v40, %v1173_v39 }
0x1555   :  { %v1176_v42 = vadd.f32 %v1175_v41, %v1168_v38 }
0x1557   :  { %v1177_v43 = vmax.f32 %v1176_v42, 1e-08 }
0x1559   :  { %1537 = vrcp.f32 %v1177_v43 }
0x1563   :  { %v1538_v44 = vpop.eup %1537 }
0x1564   :  { %v1179_v45 = vmul.f32 %v1538_v44, %v1177_v43 }
0x1566   :  { %v1180_v46 = vsub.f32 2.0, %v1179_v45 }
0x1568   :  { %v1181_v47 = vmul.f32 %v1538_v44, %v1180_v46 }
0x156a   :  { %v1182_v48 = vmul.f32 %v1181_v47, %v1177_v43 }
0x156c   :  { %v1183_v50 = vsub.f32 2.0, %v1182_v48 }
0x156e   :  { %v1184_v51 = vmul.f32 %v1183_v50, %v1181_v47 }
0x1570   :  { %v1185_v52 = vmul.f32 %v1184_v51, %v1132_v21 }
0x1572   :  { %1190 = vrot.lane.b32.xlu1 %v1185_v52, %s1579_s29  ;;  %1187 = vrot.lane.b32.xlu0 %v1185_v52, %s1578_s28 }
0x1576   :  { %1198 = vrot.lane.b32.xlu1 %v1185_v52, %s1573_s23  ;;  %1195 = vrot.lane.b32.xlu0 %v1185_v52, %s1577_s2 }
0x157a   :  { %1206 = vrot.lane.b32.xlu1 %v1185_v52, %s1580_s30  ;;  %1203 = vrot.lane.b32.xlu0 %v1185_v52, %s1581_s4 }
0x15e4   :  { %v1191_v18 = vpop.permute.xlu1 %1190  ;;  %v1188_v53 = vpop.permute.xlu0 %1187 }
0x15e5   :  { %v1193_v54 = vsel %vm489_vm7, %v1188_v53, %v1191_v18 }
0x15e6   :  { %v1194_v58 = vadd.f32 %v1193_v54, %v1185_v52 }
0x15e8   :  { %v1199_v55 = vpop.permute.xlu1 %1198  ;;  %v1196_v56 = vpop.permute.xlu0 %1195 }
0x15e9   :  { %v1201_v57 = vsel %vm498_vm8, %v1196_v56, %v1199_v55 }
0x15ea   :  { %v1202_v59 = vadd.f32 %v1201_v57, %v1194_v58 }
0x15ec   :  { %v1207_v60 = vpop.permute.xlu1 %1206  ;;  %v1204_v61 = vpop.permute.xlu0 %1203 }
0x15ed   :  { %v1209_v62 = vsel %vm507_vm9, %v1204_v61, %v1207_v60 }
0x15ee   :  { %v1210_v63 = vadd.f32 %v1209_v62, %v1202_v59 }
0x15f0   :  { %v1211_v0 = vmax.f32 %v1210_v63, 1e-08 }
0x15f2   :  { %1539 = vrcp.f32 %v1211_v0 }
0x15fc   :  { %v1540_v1 = vpop.eup %1539 }
0x15fd   :  { %v1213_v2 = vmul.f32 %v1540_v1, %v1211_v0 }
0x15ff   :  { %v1214_v3 = vsub.f32 2.0, %v1213_v2 }
0x1601   :  { %v1215_v4 = vmul.f32 %v1540_v1, %v1214_v3 }
0x1603   :  { %v1216_v5 = vmul.f32 %v1215_v4, %v1211_v0 }
0x1605   :  { %v1217_v6 = vsub.f32 2.0, %v1216_v5 }
0x1607   :  { %v1218_v7 = vmul.f32 %v1217_v6, %v1215_v4 }
0x1609   :  { %v1219_v8 = vmul.f32 %v1218_v7, %v1185_v52 }
0x160b   :  { %1224 = vrot.lane.b32.xlu1 %v1219_v8, %s1582_s5  ;;  %1221 = vrot.lane.b32.xlu0 %v1219_v8, %s1583_s6 }
0x167d   :  { %v1225_v9 = vpop.permute.xlu1 %1224  ;;  %v1222_v10 = vpop.permute.xlu0 %1221 }
0x167e   :  { %v1227_v11 = vsel %vm526_vm10, %v1222_v10, %v1225_v9 }
0x167f   :  { %v1228_v12 = vadd.f32 %v1227_v11, %v1219_v8 }
0x1681   :  { %1233 = vrot.lane.b32.xlu1 %v1228_v12, %s1584_s7  ;;  %1230 = vrot.lane.b32.xlu0 %v1228_v12, %s1585_s8 }
0x16f3   :  { %v1234_v13 = vpop.permute.xlu1 %1233  ;;  %v1231_v14 = vpop.permute.xlu0 %1230 }
0x16f4   :  { %v1236_v15 = vsel %vm536_vm11, %v1231_v14, %v1234_v13 }
0x16f5   :  { %v1237_v16 = vadd.f32 %v1236_v15, %v1228_v12 }
0x16f7   :  { %v1238_v17 = vsel %vm1679_vm12, %v1237_v16, 0.0 }
0x16f8   :  { %1243 = vrot.lane.b32.xlu1 %v1238_v17, %s1586_s9  ;;  %1240 = vrot.lane.b32.xlu0 %v1238_v17, %s1587_s10 }
0x16fc   :  { %1251 = vrot.lane.b32.xlu1 %v1238_v17, %s1588_s11  ;;  %1248 = vrot.lane.b32.xlu0 %v1238_v17, %s1589_s12 }
0x1700   :  { %1259 = vrot.lane.b32.xlu1 %v1238_v17, %s1590_s13  ;;  %1256 = vrot.lane.b32.xlu0 %v1238_v17, %s1591_s14 }
0x176a   :  { %v1244_v19 = vpop.permute.xlu1 %1243  ;;  %v1241_v20 = vpop.permute.xlu0 %1240 }
0x176b   :  { %v1246_v21 = vsel %vm547_vm13, %v1241_v20, %v1244_v19 }
0x176c   :  { %v1247_v25 = vadd.f32 %v1246_v21, %v1238_v17 }
0x176e   :  { %v1252_v22 = vpop.permute.xlu1 %1251  ;;  %v1249_v23 = vpop.permute.xlu0 %1248 }
0x176f   :  { %v1254_v24 = vsel %vm556_vm14, %v1249_v23, %v1252_v22 }
0x1770   :  { %v1255_v26 = vadd.f32 %v1254_v24, %v1247_v25 }
0x1772   :  { %v1260_v27 = vpop.permute.xlu1 %1259  ;;  %v1257_v28 = vpop.permute.xlu0 %1256 }
0x1773   :  { %v1262_v29 = vsel %vm565_vm15, %v1257_v28, %v1260_v27 }
0x1774   :  { %v1263_v30 = vadd.f32 %v1262_v29, %v1255_v26 }
0x1776   :  { %v1264_v31 = vmax.f32 %v1263_v30, 1e-08 }
0x1778   :  { %1541 = vrcp.f32 %v1264_v31 }
0x1782   :  { %v1542_v32 = vpop.eup %1541 }
0x1783   :  { %v1266_v33 = vmul.f32 %v1542_v32, %v1264_v31 }
0x1785   :  { %v1267_v34 = vsub.f32 2.0, %v1266_v33 }
0x1787   :  { %v1268_v35 = vmul.f32 %v1542_v32, %v1267_v34 }
0x1789   :  { %v1269_v36 = vmul.f32 %v1268_v35, %v1264_v31 }
0x178b   :  { %v1270_v37 = vsub.f32 2.0, %v1269_v36 }
0x178d   :  { %v1271_v38 = vmul.f32 %v1270_v37, %v1268_v35 }
0x178f   :  { %v1272_v39 = vmul.f32 %v1271_v38, %v1219_v8 }
0x1791   :  { %1277 = vrot.lane.b32.xlu1 %v1272_v39, %s1579_s29  ;;  %1274 = vrot.lane.b32.xlu0 %v1272_v39, %s1578_s28 }
0x1795   :  { %1285 = vrot.lane.b32.xlu1 %v1272_v39, %s1573_s23  ;;  %1282 = vrot.lane.b32.xlu0 %v1272_v39, %s1577_s2 }
0x1799   :  { %1293 = vrot.lane.b32.xlu1 %v1272_v39, %s1580_s30  ;;  %1290 = vrot.lane.b32.xlu0 %v1272_v39, %s1581_s4 }
0x1803   :  { %v1278_v40 = vpop.permute.xlu1 %1277  ;;  %v1275_v41 = vpop.permute.xlu0 %1274 }
0x1804   :  { %v1280_v42 = vsel %vm489_vm7, %v1275_v41, %v1278_v40 }
0x1805   :  { %v1281_v46 = vadd.f32 %v1280_v42, %v1272_v39 }
0x1807   :  { %v1286_v43 = vpop.permute.xlu1 %1285  ;;  %v1283_v44 = vpop.permute.xlu0 %1282 }
0x1808   :  { %v1288_v45 = vsel %vm498_vm8, %v1283_v44, %v1286_v43 }
0x1809   :  { %v1289_v47 = vadd.f32 %v1288_v45, %v1281_v46 }
0x180b   :  { %v1294_v48 = vpop.permute.xlu1 %1293  ;;  %v1291_v50 = vpop.permute.xlu0 %1290 }
0x180c   :  { %v1296_v51 = vsel %vm507_vm9, %v1291_v50, %v1294_v48 }
0x180d   :  { %v1297_v52 = vadd.f32 %v1296_v51, %v1289_v47 }
0x180f   :  { %v1298_v18 = vmax.f32 %v1297_v52, 1e-08 }
0x1811   :  { %1543 = vrcp.f32 %v1298_v18 }
0x181b   :  { %v1544_v53 = vpop.eup %1543 }
0x181c   :  { %v1300_v54 = vmul.f32 %v1544_v53, %v1298_v18 }
0x181e   :  { %v1301_v55 = vsub.f32 2.0, %v1300_v54 }
0x1820   :  { %v1302_v56 = vmul.f32 %v1544_v53, %v1301_v55 }
0x1822   :  { %v1303_v57 = vmul.f32 %v1302_v56, %v1298_v18 }
0x1824   :  { %v1304_v58 = vsub.f32 2.0, %v1303_v57 }
0x1826   :  { %v1305_v59 = vmul.f32 %v1304_v58, %v1302_v56 }
0x1828   :  { %v1306_v60 = vmul.f32 %v1305_v59, %v1272_v39 }
0x182a   :  { %1311 = vrot.lane.b32.xlu1 %v1306_v60, %s1582_s5  ;;  %1308 = vrot.lane.b32.xlu0 %v1306_v60, %s1583_s6 }
0x189c   :  { %v1312_v61 = vpop.permute.xlu1 %1311  ;;  %v1309_v62 = vpop.permute.xlu0 %1308 }
0x189d   :  { %v1314_v63 = vsel %vm526_vm10, %v1309_v62, %v1312_v61 }
0x189e   :  { %v1315_v0 = vadd.f32 %v1314_v63, %v1306_v60 }
0x18a0   :  { %1320 = vrot.lane.b32.xlu1 %v1315_v0, %s1584_s7  ;;  %1317 = vrot.lane.b32.xlu0 %v1315_v0, %s1585_s8 }
0x1912   :  { %v1321_v1 = vpop.permute.xlu1 %1320  ;;  %v1318_v2 = vpop.permute.xlu0 %1317 }
0x1913   :  { %v1323_v3 = vsel %vm536_vm11, %v1318_v2, %v1321_v1 }
0x1914   :  { %v1324_v4 = vadd.f32 %v1323_v3, %v1315_v0 }
0x1916   :  { %v1325_v5 = vsel %vm1679_vm12, %v1324_v4, 0.0 }
0x1917   :  { %1330 = vrot.lane.b32.xlu1 %v1325_v5, %s1586_s9  ;;  %1327 = vrot.lane.b32.xlu0 %v1325_v5, %s1587_s10 }
0x191b   :  { %1338 = vrot.lane.b32.xlu1 %v1325_v5, %s1588_s11  ;;  %1335 = vrot.lane.b32.xlu0 %v1325_v5, %s1589_s12 }
0x191f   :  { %1346 = vrot.lane.b32.xlu1 %v1325_v5, %s1590_s13  ;;  %1343 = vrot.lane.b32.xlu0 %v1325_v5, %s1591_s14 }
0x1989   :  { %v1331_v6 = vpop.permute.xlu1 %1330  ;;  %v1328_v7 = vpop.permute.xlu0 %1327 }
0x198a   :  { %v1333_v8 = vsel %vm547_vm13, %v1328_v7, %v1331_v6 }
0x198b   :  { %v1334_v11 = vadd.f32 %v1333_v8, %v1325_v5 }
0x198d   :  { %v1339_v9 = vpop.permute.xlu1 %1338  ;;  %v1336_v10 = vpop.permute.xlu0 %1335 }
0x198e   :  { %v1341_v49 = vsel %vm556_vm14, %v1336_v10, %v1339_v9 }
0x198f   :  { %v1342_v12 = vadd.f32 %v1341_v49, %v1334_v11 }
0x1991   :  { %v1347_v13 = vpop.permute.xlu1 %1346  ;;  %v1344_v14 = vpop.permute.xlu0 %1343 }
0x1992   :  { %v1349_v15 = vsel %vm565_vm15, %v1344_v14, %v1347_v13 }
0x1993   :  { %v1350_v16 = vadd.f32 %v1349_v15, %v1342_v12 }
0x1995   :  { %v1351_v17 = vmax.f32 %v1350_v16, 1e-08 }
0x1997   :  { %1545 = vrcp.f32 %v1351_v17 }
0x19a1   :  { %v1546_v19 = vpop.eup %1545 }
0x19a2   :  { %v1353_v20 = vmul.f32 %v1546_v19, %v1351_v17 }
0x19a4   :  { %v1354_v21 = vsub.f32 2.0, %v1353_v20 }
0x19a6   :  { %v1355_v22 = vmul.f32 %v1546_v19, %v1354_v21 }
0x19a8   :  { %v1356_v23 = vmul.f32 %v1355_v22, %v1351_v17 }
0x19aa   :  { %v1357_v24 = vsub.f32 2.0, %v1356_v23 }
0x19ac   :  { %v1358_v25 = vmul.f32 %v1357_v24, %v1355_v22 }
0x19ae   :  { %v1359_v26 = vmul.f32 %v1358_v25, %v1306_v60 }
0x19b0   :  { %1361 = vst.msk [vmem:[%s1935_s3] sm:$0xff] %vm1360_vm0, %v1359_v26 }
0x19b1   :  { %1366 = vsyncpa [#allocation3], 1 }

</bundles_post_ra>
